<compile_context>
chip_gen: v7x
topology: tpu7x:2x2x1
jax: 0.10.0
libtpu: 0.0.40
codegen_flags: <defaults>
</compile_context>

<pallas_src>
import jax
import jax.numpy as jnp
from jax.experimental import pallas as pl
from jax.experimental.pallas import tpu as pltpu

_MXU_DTYPE = jnp.bfloat16     # matmul operand dtype (f32 accumulation)
_LN_EPS = 1e-5                # torch.nn.LayerNorm default


def _round_up(x, m):
    return ((x + m - 1) // m) * m


# ----------------------------------------------------------------------------
# Static slab layouts (pure Python, derived from the config; used both when
# packing the parameters and when carving the slabs with static slices
# inside the kernel).
# ----------------------------------------------------------------------------
def _encoder_layout(vocab, seq, hidden, num_layers, head_rows, head_cols):
    H = hidden
    width = _round_up(max(4 * H, head_cols, 128), 128)

    mat = {"layers": []}
    r = 0
    mat["embed"] = r; r += vocab
    for _ in range(num_layers):
        d = {}
        d["wqkv"] = r; r += H          # (H, 3H)  fused q|k|v projection
        d["wo"]   = r; r += H          # (H, H)
        d["w1"]   = r; r += H          # (H, 4H)
        d["w2"]   = r; r += 4 * H      # (4H, H)
        mat["layers"].append(d)
    mat["head_w"] = r; r += head_rows  # ws (Hs,Ht) for source / wt (Lt,Opt) for target
    mat_rows = _round_up(r, 16)        # bf16 sublane tile

    vec = {"layers": []}
    r = 0
    vec["pos"] = r; r += seq           # positional table kept f32
    for _ in range(num_layers):
        d = {}
        for name in ("bqkv", "bo", "ln1g", "ln1b", "b1", "b2", "ln2g", "ln2b"):
            d[name] = r; r += 1
        vec["layers"].append(d)
    vec["head_b"] = r; r += 1
    vec_rows = _round_up(r, 8)

    return dict(mat=mat, vec=vec, mat_rows=mat_rows, vec_rows=vec_rows,
                width=width)


# ----------------------------------------------------------------------------
# In-kernel helpers (traced into the single fused kernel)
# ----------------------------------------------------------------------------
def _mm(a, b):
    """a @ b on the MXU, bf16 operands, f32 accumulation.  astype on an
    already-bf16 slab slice is a trace-time no-op (no VPU cast emitted)."""
    return jnp.dot(a.astype(_MXU_DTYPE), b.astype(_MXU_DTYPE),
                   preferred_element_type=jnp.float32)


def _mm_t(a, b):
    """a @ b.T without an explicit transpose (contract last dims of both)."""
    return jax.lax.dot_general(
        a.astype(_MXU_DTYPE), b.astype(_MXU_DTYPE),
        (((1,), (1,)), ((), ())),
        preferred_element_type=jnp.float32)


def _layer_norm(x, g, b):
    mu = jnp.mean(x, axis=-1, keepdims=True)
    var = jnp.mean((x - mu) ** 2, axis=-1, keepdims=True)
    return (x - mu) * jax.lax.rsqrt(var + _LN_EPS) * g + b


def _softmax_attn(x):
    """Attention softmax: approx reciprocal on the EUP slot (free)."""
    x = x - jnp.max(x, axis=-1, keepdims=True)
    e = jnp.exp(x)
    return e * pl.reciprocal(jnp.sum(e, axis=-1, keepdims=True), approx=True)


def _softmax_exact(x):
    """Final output softmax: exact divide so probabilities sum to 1."""
    x = x - jnp.max(x, axis=-1, keepdims=True)
    e = jnp.exp(x)
    return e / jnp.sum(e, axis=-1, keepdims=True)


# ----------------------------------------------------------------------------
# The single fused kernel (built per config so slab offsets are static)
# ----------------------------------------------------------------------------
def _make_kernel(cfg, src_layout, tgt_layout):
    Ls = cfg["max_source_seq_length"]
    Lt = cfg["max_target_seq_length"]
    Hs = cfg["source_hidden_embedding_size"]
    Ht = cfg["target_hidden_embedding_size"]
    Opt = cfg["max_target_options"]
    V = cfg["num_of_shared_vocabularies"]
    L = cfg["num_of_encoder_layers"]

    def embed(tok_ref, tok_off, seq, hidden, mat_ref, vec_ref, layout):
        # Token ids come from SMEM scalars; build the (S, V) one-hot on the
        # VPU and select embedding rows with one bf16 MXU matmul (exact for a
        # 0/1 one-hot).  Positional add stays f32.
        row_iota = jax.lax.broadcasted_iota(jnp.int32, (seq, V), 0)
        col_iota = jax.lax.broadcasted_iota(jnp.int32, (seq, V), 1)
        tok_mat = jnp.zeros((seq, V), jnp.int32)
        for i in range(seq):                              # S scalar SMEM reads
            tok_mat = jnp.where(row_iota == i, tok_ref[tok_off + i], tok_mat)
        onehot = (col_iota == tok_mat).astype(_MXU_DTYPE)
        e0 = layout["mat"]["embed"]
        x = jnp.dot(onehot, mat_ref[e0:e0 + V, :hidden],
                    preferred_element_type=jnp.float32)
        p0 = layout["vec"]["pos"]
        return x + vec_ref[p0:p0 + seq, :hidden]

    def enc_layer(x, mat_ref, vec_ref, ml, vl, hidden):
        H = hidden
        scale = 1.0 / float(H) ** 0.5
        # Fused Q/K/V projection: one (S,H)x(H,3H) MXU op, then static slices.
        qkv = _mm(x, mat_ref[ml["wqkv"]:ml["wqkv"] + H, :3 * H]) \
            + vec_ref[vl["bqkv"]:vl["bqkv"] + 1, :3 * H]
        q = qkv[:, :H]
        k = qkv[:, H:2 * H]
        v = qkv[:, 2 * H:3 * H]

        p = _softmax_attn(_mm_t(q, k) * scale)            # (S, S)
        attn = _mm(p, v)                                  # (S, H)
        o = _mm(attn, mat_ref[ml["wo"]:ml["wo"] + H, :H]) \
            + vec_ref[vl["bo"]:vl["bo"] + 1, :H]
        x1 = _layer_norm(x + o,
                         vec_ref[vl["ln1g"]:vl["ln1g"] + 1, :H],
                         vec_ref[vl["ln1b"]:vl["ln1b"] + 1, :H])

        ff = jnp.maximum(
            _mm(x1, mat_ref[ml["w1"]:ml["w1"] + H, :4 * H])
            + vec_ref[vl["b1"]:vl["b1"] + 1, :4 * H], 0.0)        # (S, 4H)
        ff = _mm(ff, mat_ref[ml["w2"]:ml["w2"] + 4 * H, :H]) \
            + vec_ref[vl["b2"]:vl["b2"] + 1, :H]                  # (S, H)
        return _layer_norm(x1 + ff,
                           vec_ref[vl["ln2g"]:vl["ln2g"] + 1, :H],
                           vec_ref[vl["ln2b"]:vl["ln2b"] + 1, :H])

    def kernel(tok_ref, src_mat, src_vec, tgt_mat, tgt_vec, out_ref):
        src_x = embed(tok_ref, 0, Ls, Hs, src_mat, src_vec, src_layout)
        tgt_x = embed(tok_ref, Ls, Lt, Ht, tgt_mat, tgt_vec, tgt_layout)

        # Interleave the two independent encoder chains layer-by-layer; the
        # whole kernel is one basic block so the scheduler can co-issue the
        # two chains' MXU/VPU/XLU/EUP slots and hide push->pop latency.
        # TODO(synk): on v7x run the two encoders on the two TensorCores via
        #             pl.core_map / create_tensorcore_mesh.
        for l in range(L):
            src_x = enc_layer(src_x, src_mat, src_vec,
                              src_layout["mat"]["layers"][l],
                              src_layout["vec"]["layers"][l], Hs)
            tgt_x = enc_layer(tgt_x, tgt_mat, tgt_vec,
                              tgt_layout["mat"]["layers"][l],
                              tgt_layout["vec"]["layers"][l], Ht)

        # Zero-shot head.
        hw, hb = src_layout["mat"]["head_w"], src_layout["vec"]["head_b"]
        s = _mm(src_x[Ls - 1:Ls, :], src_mat[hw:hw + Hs, :Ht]) \
            + src_vec[hb:hb + 1, :Ht]                              # (1, Ht)

        # logits = s @ (tgt^T @ Wt + 1*bt) == (s @ tgt^T) @ Wt + sum(s)*bt
        st = _mm_t(s, tgt_x)                                       # (1, Lt)
        hw2, hb2 = tgt_layout["mat"]["head_w"], tgt_layout["vec"]["head_b"]
        logits = _mm(st, tgt_mat[hw2:hw2 + Lt, :Opt]) \
            + jnp.sum(s, axis=-1, keepdims=True) * tgt_vec[hb2:hb2 + 1, :Opt]

        out_ref[...] = _softmax_exact(logits)                      # (1, Opt)

    return kernel


# ----------------------------------------------------------------------------
# Parameter construction (deterministic, synthetic), packing, forward wrapper
# ----------------------------------------------------------------------------
def _init_linear(key, fan_in, fan_out):
    kw, kb = jax.random.split(key)
    scale = 1.0 / float(fan_in) ** 0.5
    w = jax.random.uniform(kw, (fan_in, fan_out), jnp.float32, -scale, scale)
    b = jax.random.uniform(kb, (1, fan_out), jnp.float32, -scale, scale)
    return w, b


def init_encoder_params(key, vocab, seq_len, hidden, num_layers):
    keys = jax.random.split(key, 2 + num_layers)
    layers = []
    for l in range(num_layers):
        lk = jax.random.split(keys[2 + l], 6)
        wq, bq = _init_linear(lk[0], hidden, hidden)
        wk, bk = _init_linear(lk[1], hidden, hidden)
        wv, bv = _init_linear(lk[2], hidden, hidden)
        wo, bo = _init_linear(lk[3], hidden, hidden)
        w1, b1 = _init_linear(lk[4], hidden, 4 * hidden)
        w2, b2 = _init_linear(lk[5], 4 * hidden, hidden)
        layers.append(dict(
            wq=wq, bq=bq, wk=wk, bk=bk, wv=wv, bv=bv, wo=wo, bo=bo,
            ln1g=jnp.ones((1, hidden), jnp.float32),
            ln1b=jnp.zeros((1, hidden), jnp.float32),
            w1=w1, b1=b1, w2=w2, b2=b2,
            ln2g=jnp.ones((1, hidden), jnp.float32),
            ln2b=jnp.zeros((1, hidden), jnp.float32)))
    return dict(
        embed=0.02 * jax.random.normal(keys[0], (vocab, hidden), jnp.float32),
        pos=0.02 * jax.random.normal(keys[1], (seq_len, hidden), jnp.float32),
        layers=layers)


def init_zero_shot_params(key, cfg):
    k_src, k_tgt, k_ms, k_mt = jax.random.split(key, 4)
    ws, bs = _init_linear(k_ms, cfg["source_hidden_embedding_size"],
                          cfg["target_hidden_embedding_size"])
    wt, bt = _init_linear(k_mt, cfg["max_target_seq_length"],
                          cfg["max_target_options"])
    return dict(
        source_encoder=init_encoder_params(
            k_src, cfg["num_of_shared_vocabularies"],
            cfg["max_source_seq_length"],
            cfg["source_hidden_embedding_size"],
            cfg["num_of_encoder_layers"]),
        target_encoder=init_encoder_params(
            k_tgt, cfg["num_of_shared_vocabularies"],
            cfg["max_target_seq_length"],
            cfg["target_hidden_embedding_size"],
            cfg["num_of_encoder_layers"]),
        mlp_source_w=ws, mlp_source_b=bs,    # Linear(Hs -> Ht)
        mlp_target_w=wt, mlp_target_b=bt)    # Linear(Lt -> Opt)


def _put(slab, row, a):
    a = jnp.asarray(a, slab.dtype)
    if a.ndim == 1:
        a = a[None, :]
    return slab.at[row:row + a.shape[0], :a.shape[1]].set(a)


def _pack_encoder(enc, head_w, head_b, layout):
    """Pack one encoder (+ its head weight) into a bf16 matrix slab and an
    f32 vector slab at the static offsets given by `layout`."""
    mat = jnp.zeros((layout["mat_rows"], layout["width"]), jnp.bfloat16)
    vec = jnp.zeros((layout["vec_rows"], layout["width"]), jnp.float32)
    m, v = layout["mat"], layout["vec"]
    mat = _put(mat, m["embed"], enc["embed"])
    vec = _put(vec, v["pos"], enc["pos"])
    for l, lp in enumerate(enc["layers"]):
        ml, vl = m["layers"][l], v["layers"][l]
        mat = _put(mat, ml["wqkv"],
                   jnp.concatenate([lp["wq"], lp["wk"], lp["wv"]], axis=1))
        mat = _put(mat, ml["wo"], lp["wo"])
        mat = _put(mat, ml["w1"], lp["w1"])
        mat = _put(mat, ml["w2"], lp["w2"])
        vec = _put(vec, vl["bqkv"],
                   jnp.concatenate([lp["bq"], lp["bk"], lp["bv"]], axis=1))
        vec = _put(vec, vl["bo"], lp["bo"])
        vec = _put(vec, vl["ln1g"], lp["ln1g"])
        vec = _put(vec, vl["ln1b"], lp["ln1b"])
        vec = _put(vec, vl["b1"], lp["b1"])
        vec = _put(vec, vl["b2"], lp["b2"])
        vec = _put(vec, vl["ln2g"], lp["ln2g"])
        vec = _put(vec, vl["ln2b"], lp["ln2b"])
    mat = _put(mat, m["head_w"], head_w)
    vec = _put(vec, v["head_b"], head_b)
    return mat, vec


def build_zero_shot_forward(cfg):
    src_layout = _encoder_layout(
        cfg["num_of_shared_vocabularies"], cfg["max_source_seq_length"],
        cfg["source_hidden_embedding_size"], cfg["num_of_encoder_layers"],
        head_rows=cfg["source_hidden_embedding_size"],
        head_cols=cfg["target_hidden_embedding_size"])
    tgt_layout = _encoder_layout(
        cfg["num_of_shared_vocabularies"], cfg["max_target_seq_length"],
        cfg["target_hidden_embedding_size"], cfg["num_of_encoder_layers"],
        head_rows=cfg["max_target_seq_length"],
        head_cols=cfg["max_target_options"])

    kernel = _make_kernel(cfg, src_layout, tgt_layout)
    vmem = pl.BlockSpec(memory_space=pltpu.MemorySpace.VMEM)
    smem = pl.BlockSpec(memory_space=pltpu.MemorySpace.SMEM)
    call = pl.pallas_call(
        kernel,
        out_shape=jax.ShapeDtypeStruct((1, cfg["max_target_options"]),
                                       jnp.float32),
        in_specs=[smem, vmem, vmem, vmem, vmem],   # tokens, 2x(mat, vec) slabs
        out_specs=vmem,
    )

    @jax.jit
    def forward(packed, source_seq, target_seq):
        tok = jnp.concatenate(
            [source_seq.astype(jnp.int32), target_seq.astype(jnp.int32)])
        return call(tok, packed["src_mat"], packed["src_vec"],
                    packed["tgt_mat"], packed["tgt_vec"])

    return forward, src_layout, tgt_layout


def pack_zero_shot_params(params, src_layout, tgt_layout):
    src_mat, src_vec = _pack_encoder(params["source_encoder"],
                                     params["mlp_source_w"],
                                     params["mlp_source_b"], src_layout)
    tgt_mat, tgt_vec = _pack_encoder(params["target_encoder"],
                                     params["mlp_target_w"],
                                     params["mlp_target_b"], tgt_layout)
    return dict(src_mat=src_mat, src_vec=src_vec,
                tgt_mat=tgt_mat, tgt_vec=tgt_vec)


# ----------------------------------------------------------------------------
if __name__ == "__main__":
    cfg = dict(
        max_source_seq_length=8,
        max_target_seq_length=8,
        source_hidden_embedding_size=32,
        target_hidden_embedding_size=32,
        max_target_options=8,
        num_of_shared_vocabularies=16,
        num_of_encoder_layers=2)

    key = jax.random.PRNGKey(0)
    k_params, k_src, k_tgt = jax.random.split(key, 3)
    params = init_zero_shot_params(k_params, cfg)

    forward, src_layout, tgt_layout = build_zero_shot_forward(cfg)
    packed = pack_zero_shot_params(params, src_layout, tgt_layout)

    source_seq = jax.random.randint(
        k_src, (cfg["max_source_seq_length"],), 0,
        cfg["num_of_shared_vocabularies"], jnp.int32)
    target_seq = jax.random.randint(
        k_tgt, (cfg["max_target_seq_length"],), 0,
        cfg["num_of_shared_vocabularies"], jnp.int32)

    out = jax.block_until_ready(forward(packed, source_seq, target_seq))

    assert out.shape == (1, cfg["max_target_options"])
    assert bool(jnp.all(jnp.isfinite(out)))
    # Exact-divide output softmax: probabilities sum to 1.
    assert abs(float(jnp.sum(out)) - 1.0) < 1e-4
    print("KERNEL_OK")
</pallas_src>

<mosaic_0001>
module attributes {stable_mosaic.version = 11 : i64} {
  func.func @kernel(%arg0: memref<16xi32, #tpu.memory_space<smem>>, %arg1: memref<496x128xbf16, #tpu.memory_space<vmem>>, %arg2: memref<32x128xf32, #tpu.memory_space<vmem>>, %arg3: memref<480x128xbf16, #tpu.memory_space<vmem>>, %arg4: memref<32x128xf32, #tpu.memory_space<vmem>>, %arg5: memref<1x8xf32, #tpu.memory_space<vmem>>) attributes {dimension_semantics = [], scalar_prefetch = 0 : i64, scratch_operands = 0 : i64, tpu.core_type = #tpu.core_type<tc>} {
    %0 = tpu.iota {dimensions = array<i32: 0>} : vector<8x16xi32>
    %1 = tpu.iota {dimensions = array<i32: 1>} : vector<8x16xi32>
    %c0_i32 = arith.constant 0 : i32
    %2 = vector.broadcast %c0_i32 : i32 to vector<8x16xi32>
    %c0_i32_0 = arith.constant 0 : i32
    %3 = vector.broadcast %c0_i32_0 : i32 to vector<8x16xi32>
    %4 = arith.cmpi eq, %0, %3 : vector<8x16xi32>
    %c0 = arith.constant 0 : index
    %5 = memref.load %arg0[%c0] : memref<16xi32, #tpu.memory_space<smem>>
    %6 = vector.broadcast %5 : i32 to vector<8x16xi32>
    %7 = arith.select %4, %6, %2 : vector<8x16xi1>, vector<8x16xi32>
    %c1_i32 = arith.constant 1 : i32
    %8 = vector.broadcast %c1_i32 : i32 to vector<8x16xi32>
    %9 = arith.cmpi eq, %0, %8 : vector<8x16xi32>
    %c1 = arith.constant 1 : index
    %10 = memref.load %arg0[%c1] : memref<16xi32, #tpu.memory_space<smem>>
    %11 = vector.broadcast %10 : i32 to vector<8x16xi32>
    %12 = arith.select %9, %11, %7 : vector<8x16xi1>, vector<8x16xi32>
    %c2_i32 = arith.constant 2 : i32
    %13 = vector.broadcast %c2_i32 : i32 to vector<8x16xi32>
    %14 = arith.cmpi eq, %0, %13 : vector<8x16xi32>
    %c2 = arith.constant 2 : index
    %15 = memref.load %arg0[%c2] : memref<16xi32, #tpu.memory_space<smem>>
    %16 = vector.broadcast %15 : i32 to vector<8x16xi32>
    %17 = arith.select %14, %16, %12 : vector<8x16xi1>, vector<8x16xi32>
    %c3_i32 = arith.constant 3 : i32
    %18 = vector.broadcast %c3_i32 : i32 to vector<8x16xi32>
    %19 = arith.cmpi eq, %0, %18 : vector<8x16xi32>
    %c3 = arith.constant 3 : index
    %20 = memref.load %arg0[%c3] : memref<16xi32, #tpu.memory_space<smem>>
    %21 = vector.broadcast %20 : i32 to vector<8x16xi32>
    %22 = arith.select %19, %21, %17 : vector<8x16xi1>, vector<8x16xi32>
    %c4_i32 = arith.constant 4 : i32
    %23 = vector.broadcast %c4_i32 : i32 to vector<8x16xi32>
    %24 = arith.cmpi eq, %0, %23 : vector<8x16xi32>
    %c4 = arith.constant 4 : index
    %25 = memref.load %arg0[%c4] : memref<16xi32, #tpu.memory_space<smem>>
    %26 = vector.broadcast %25 : i32 to vector<8x16xi32>
    %27 = arith.select %24, %26, %22 : vector<8x16xi1>, vector<8x16xi32>
    %c5_i32 = arith.constant 5 : i32
    %28 = vector.broadcast %c5_i32 : i32 to vector<8x16xi32>
    %29 = arith.cmpi eq, %0, %28 : vector<8x16xi32>
    %c5 = arith.constant 5 : index
    %30 = memref.load %arg0[%c5] : memref<16xi32, #tpu.memory_space<smem>>
    %31 = vector.broadcast %30 : i32 to vector<8x16xi32>
    %32 = arith.select %29, %31, %27 : vector<8x16xi1>, vector<8x16xi32>
    %c6_i32 = arith.constant 6 : i32
    %33 = vector.broadcast %c6_i32 : i32 to vector<8x16xi32>
    %34 = arith.cmpi eq, %0, %33 : vector<8x16xi32>
    %c6 = arith.constant 6 : index
    %35 = memref.load %arg0[%c6] : memref<16xi32, #tpu.memory_space<smem>>
    %36 = vector.broadcast %35 : i32 to vector<8x16xi32>
    %37 = arith.select %34, %36, %32 : vector<8x16xi1>, vector<8x16xi32>
    %c7_i32 = arith.constant 7 : i32
    %38 = vector.broadcast %c7_i32 : i32 to vector<8x16xi32>
    %39 = arith.cmpi eq, %0, %38 : vector<8x16xi32>
    %c7 = arith.constant 7 : index
    %40 = memref.load %arg0[%c7] : memref<16xi32, #tpu.memory_space<smem>>
    %41 = vector.broadcast %40 : i32 to vector<8x16xi32>
    %42 = arith.select %39, %41, %37 : vector<8x16xi1>, vector<8x16xi32>
    %43 = arith.cmpi eq, %1, %42 : vector<8x16xi32>
    %44 = arith.extui %43 : vector<8x16xi1> to vector<8x16xi32>
    %45 = arith.sitofp %44 : vector<8x16xi32> to vector<8x16xf32>
    %46 = arith.truncf %45 : vector<8x16xf32> to vector<8x16xbf16>
    %c0_1 = arith.constant 0 : index
    %c0_2 = arith.constant 0 : index
    %47 = vector.load %arg1[%c0_1, %c0_2] : memref<496x128xbf16, #tpu.memory_space<vmem>>, vector<16x32xbf16>
    %cst = arith.constant dense<0.000000e+00> : vector<8x32xf32>
    %48 = tpu.matmul %46, %47, %cst {dimension_numbers = #tpu.dot_dimension_numbers<[1], [0], [0], [1], [0, 0, 1, 1], [], []>} : vector<8x16xbf16>, vector<16x32xbf16>, vector<8x32xf32> -> vector<8x32xf32>
    %c0_3 = arith.constant 0 : index
    %c0_4 = arith.constant 0 : index
    %49 = vector.load %arg2[%c0_3, %c0_4] : memref<32x128xf32, #tpu.memory_space<vmem>>, vector<8x32xf32>
    %50 = arith.addf %48, %49 : vector<8x32xf32>
    %51 = tpu.iota {dimensions = array<i32: 0>} : vector<8x16xi32>
    %52 = tpu.iota {dimensions = array<i32: 1>} : vector<8x16xi32>
    %c0_i32_5 = arith.constant 0 : i32
    %53 = vector.broadcast %c0_i32_5 : i32 to vector<8x16xi32>
    %c0_i32_6 = arith.constant 0 : i32
    %54 = vector.broadcast %c0_i32_6 : i32 to vector<8x16xi32>
    %55 = arith.cmpi eq, %51, %54 : vector<8x16xi32>
    %c8 = arith.constant 8 : index
    %56 = memref.load %arg0[%c8] : memref<16xi32, #tpu.memory_space<smem>>
    %57 = vector.broadcast %56 : i32 to vector<8x16xi32>
    %58 = arith.select %55, %57, %53 : vector<8x16xi1>, vector<8x16xi32>
    %c1_i32_7 = arith.constant 1 : i32
    %59 = vector.broadcast %c1_i32_7 : i32 to vector<8x16xi32>
    %60 = arith.cmpi eq, %51, %59 : vector<8x16xi32>
    %c9 = arith.constant 9 : index
    %61 = memref.load %arg0[%c9] : memref<16xi32, #tpu.memory_space<smem>>
    %62 = vector.broadcast %61 : i32 to vector<8x16xi32>
    %63 = arith.select %60, %62, %58 : vector<8x16xi1>, vector<8x16xi32>
    %c2_i32_8 = arith.constant 2 : i32
    %64 = vector.broadcast %c2_i32_8 : i32 to vector<8x16xi32>
    %65 = arith.cmpi eq, %51, %64 : vector<8x16xi32>
    %c10 = arith.constant 10 : index
    %66 = memref.load %arg0[%c10] : memref<16xi32, #tpu.memory_space<smem>>
    %67 = vector.broadcast %66 : i32 to vector<8x16xi32>
    %68 = arith.select %65, %67, %63 : vector<8x16xi1>, vector<8x16xi32>
    %c3_i32_9 = arith.constant 3 : i32
    %69 = vector.broadcast %c3_i32_9 : i32 to vector<8x16xi32>
    %70 = arith.cmpi eq, %51, %69 : vector<8x16xi32>
    %c11 = arith.constant 11 : index
    %71 = memref.load %arg0[%c11] : memref<16xi32, #tpu.memory_space<smem>>
    %72 = vector.broadcast %71 : i32 to vector<8x16xi32>
    %73 = arith.select %70, %72, %68 : vector<8x16xi1>, vector<8x16xi32>
    %c4_i32_10 = arith.constant 4 : i32
    %74 = vector.broadcast %c4_i32_10 : i32 to vector<8x16xi32>
    %75 = arith.cmpi eq, %51, %74 : vector<8x16xi32>
    %c12 = arith.constant 12 : index
    %76 = memref.load %arg0[%c12] : memref<16xi32, #tpu.memory_space<smem>>
    %77 = vector.broadcast %76 : i32 to vector<8x16xi32>
    %78 = arith.select %75, %77, %73 : vector<8x16xi1>, vector<8x16xi32>
    %c5_i32_11 = arith.constant 5 : i32
    %79 = vector.broadcast %c5_i32_11 : i32 to vector<8x16xi32>
    %80 = arith.cmpi eq, %51, %79 : vector<8x16xi32>
    %c13 = arith.constant 13 : index
    %81 = memref.load %arg0[%c13] : memref<16xi32, #tpu.memory_space<smem>>
    %82 = vector.broadcast %81 : i32 to vector<8x16xi32>
    %83 = arith.select %80, %82, %78 : vector<8x16xi1>, vector<8x16xi32>
    %c6_i32_12 = arith.constant 6 : i32
    %84 = vector.broadcast %c6_i32_12 : i32 to vector<8x16xi32>
    %85 = arith.cmpi eq, %51, %84 : vector<8x16xi32>
    %c14 = arith.constant 14 : index
    %86 = memref.load %arg0[%c14] : memref<16xi32, #tpu.memory_space<smem>>
    %87 = vector.broadcast %86 : i32 to vector<8x16xi32>
    %88 = arith.select %85, %87, %83 : vector<8x16xi1>, vector<8x16xi32>
    %c7_i32_13 = arith.constant 7 : i32
    %89 = vector.broadcast %c7_i32_13 : i32 to vector<8x16xi32>
    %90 = arith.cmpi eq, %51, %89 : vector<8x16xi32>
    %c15 = arith.constant 15 : index
    %91 = memref.load %arg0[%c15] : memref<16xi32, #tpu.memory_space<smem>>
    %92 = vector.broadcast %91 : i32 to vector<8x16xi32>
    %93 = arith.select %90, %92, %88 : vector<8x16xi1>, vector<8x16xi32>
    %94 = arith.cmpi eq, %52, %93 : vector<8x16xi32>
    %95 = arith.extui %94 : vector<8x16xi1> to vector<8x16xi32>
    %96 = arith.sitofp %95 : vector<8x16xi32> to vector<8x16xf32>
    %97 = arith.truncf %96 : vector<8x16xf32> to vector<8x16xbf16>
    %c0_14 = arith.constant 0 : index
    %c0_15 = arith.constant 0 : index
    %98 = vector.load %arg3[%c0_14, %c0_15] : memref<480x128xbf16, #tpu.memory_space<vmem>>, vector<16x32xbf16>
    %cst_16 = arith.constant dense<0.000000e+00> : vector<8x32xf32>
    %99 = tpu.matmul %97, %98, %cst_16 {dimension_numbers = #tpu.dot_dimension_numbers<[1], [0], [0], [1], [0, 0, 1, 1], [], []>} : vector<8x16xbf16>, vector<16x32xbf16>, vector<8x32xf32> -> vector<8x32xf32>
    %c0_17 = arith.constant 0 : index
    %c0_18 = arith.constant 0 : index
    %100 = vector.load %arg4[%c0_17, %c0_18] : memref<32x128xf32, #tpu.memory_space<vmem>>, vector<8x32xf32>
    %101 = arith.addf %99, %100 : vector<8x32xf32>
    %c16 = arith.constant 16 : index
    %c0_19 = arith.constant 0 : index
    %102 = vector.load %arg1[%c16, %c0_19] : memref<496x128xbf16, #tpu.memory_space<vmem>>, vector<32x96xbf16>
    %103 = arith.truncf %50 : vector<8x32xf32> to vector<8x32xbf16>
    %cst_20 = arith.constant dense<0.000000e+00> : vector<8x96xf32>
    %104 = tpu.matmul %103, %102, %cst_20 {dimension_numbers = #tpu.dot_dimension_numbers<[1], [0], [0], [1], [0, 0, 1, 1], [], []>} : vector<8x32xbf16>, vector<32x96xbf16>, vector<8x96xf32> -> vector<8x96xf32>
    %c8_21 = arith.constant 8 : index
    %c0_22 = arith.constant 0 : index
    %105 = vector.load %arg2[%c8_21, %c0_22] : memref<32x128xf32, #tpu.memory_space<vmem>>, vector<1x96xf32>
    %106 = vector.broadcast %105 : vector<1x96xf32> to vector<8x96xf32>
    %107 = arith.addf %104, %106 : vector<8x96xf32>
    %108 = vector.extract_strided_slice %107 {offsets = [0, 0], sizes = [8, 32], strides = [1, 1]} : vector<8x96xf32> to vector<8x32xf32>
    %109 = vector.extract_strided_slice %107 {offsets = [0, 32], sizes = [8, 32], strides = [1, 1]} : vector<8x96xf32> to vector<8x32xf32>
    %110 = vector.extract_strided_slice %107 {offsets = [0, 64], sizes = [8, 32], strides = [1, 1]} : vector<8x96xf32> to vector<8x32xf32>
    %111 = arith.truncf %108 : vector<8x32xf32> to vector<8x32xbf16>
    %112 = arith.truncf %109 : vector<8x32xf32> to vector<8x32xbf16>
    %cst_23 = arith.constant dense<0.000000e+00> : vector<8x8xf32>
    %113 = tpu.matmul %111, %112, %cst_23 {dimension_numbers = #tpu.dot_dimension_numbers<[1], [1], [0], [0], [0, 0, 1, 0], [], []>} : vector<8x32xbf16>, vector<8x32xbf16>, vector<8x8xf32> -> vector<8x8xf32>
    %cst_24 = arith.constant 0.176776692 : f32
    %114 = vector.broadcast %cst_24 : f32 to vector<8x8xf32>
    %115 = arith.mulf %113, %114 : vector<8x8xf32>
    %cst_25 = arith.constant dense<0xFF800000> : vector<8xf32>
    %116 = vector.multi_reduction <maximumf>, %115, %cst_25 [1] : vector<8x8xf32> to vector<8xf32>
    %117 = vector.shape_cast %116 : vector<8xf32> to vector<8x1xf32>
    %118 = vector.broadcast %117 : vector<8x1xf32> to vector<8x8xf32>
    %119 = arith.subf %115, %118 : vector<8x8xf32>
    %120 = math.exp %119 : vector<8x8xf32>
    %cst_26 = arith.constant dense<0.000000e+00> : vector<8xf32>
    %121 = vector.multi_reduction <add>, %120, %cst_26 [1] : vector<8x8xf32> to vector<8xf32>
    %122 = vector.shape_cast %121 : vector<8xf32> to vector<8x1xf32>
    %123 = tpu.reciprocal %122 {approx = true} : vector<8x1xf32> -> vector<8x1xf32>
    %124 = vector.broadcast %123 : vector<8x1xf32> to vector<8x8xf32>
    %125 = arith.mulf %120, %124 : vector<8x8xf32>
    %126 = arith.truncf %125 : vector<8x8xf32> to vector<8x8xbf16>
    %127 = arith.truncf %110 : vector<8x32xf32> to vector<8x32xbf16>
    %cst_27 = arith.constant dense<0.000000e+00> : vector<8x32xf32>
    %128 = tpu.matmul %126, %127, %cst_27 {dimension_numbers = #tpu.dot_dimension_numbers<[1], [0], [0], [1], [0, 0, 1, 1], [], []>} : vector<8x8xbf16>, vector<8x32xbf16>, vector<8x32xf32> -> vector<8x32xf32>
    %c48 = arith.constant 48 : index
    %c0_28 = arith.constant 0 : index
    %129 = vector.load %arg1[%c48, %c0_28] : memref<496x128xbf16, #tpu.memory_space<vmem>>, vector<32x32xbf16>
    %130 = arith.truncf %128 : vector<8x32xf32> to vector<8x32xbf16>
    %cst_29 = arith.constant dense<0.000000e+00> : vector<8x32xf32>
    %131 = tpu.matmul %130, %129, %cst_29 {dimension_numbers = #tpu.dot_dimension_numbers<[1], [0], [0], [1], [0, 0, 1, 1], [], []>} : vector<8x32xbf16>, vector<32x32xbf16>, vector<8x32xf32> -> vector<8x32xf32>
    %c9_30 = arith.constant 9 : index
    %c0_31 = arith.constant 0 : index
    %132 = vector.load %arg2[%c9_30, %c0_31] : memref<32x128xf32, #tpu.memory_space<vmem>>, vector<1x32xf32>
    %133 = vector.broadcast %132 : vector<1x32xf32> to vector<8x32xf32>
    %134 = arith.addf %131, %133 : vector<8x32xf32>
    %135 = arith.addf %50, %134 : vector<8x32xf32>
    %c10_32 = arith.constant 10 : index
    %c0_33 = arith.constant 0 : index
    %136 = vector.load %arg2[%c10_32, %c0_33] : memref<32x128xf32, #tpu.memory_space<vmem>>, vector<1x32xf32>
    %c11_34 = arith.constant 11 : index
    %c0_35 = arith.constant 0 : index
    %137 = vector.load %arg2[%c11_34, %c0_35] : memref<32x128xf32, #tpu.memory_space<vmem>>, vector<1x32xf32>
    %cst_36 = arith.constant dense<0.000000e+00> : vector<8xf32>
    %138 = vector.multi_reduction <add>, %135, %cst_36 [1] : vector<8x32xf32> to vector<8xf32>
    %139 = vector.shape_cast %138 : vector<8xf32> to vector<8x1xf32>
    %cst_37 = arith.constant 3.200000e+01 : f32
    %140 = vector.broadcast %cst_37 : f32 to vector<8x1xf32>
    %141 = arith.divf %139, %140 : vector<8x1xf32>
    %142 = vector.broadcast %141 : vector<8x1xf32> to vector<8x32xf32>
    %143 = arith.subf %135, %142 : vector<8x32xf32>
    %144 = arith.mulf %143, %143 : vector<8x32xf32>
    %cst_38 = arith.constant dense<0.000000e+00> : vector<8xf32>
    %145 = vector.multi_reduction <add>, %144, %cst_38 [1] : vector<8x32xf32> to vector<8xf32>
    %146 = vector.shape_cast %145 : vector<8xf32> to vector<8x1xf32>
    %cst_39 = arith.constant 3.200000e+01 : f32
    %147 = vector.broadcast %cst_39 : f32 to vector<8x1xf32>
    %148 = arith.divf %146, %147 : vector<8x1xf32>
    %149 = vector.broadcast %141 : vector<8x1xf32> to vector<8x32xf32>
    %150 = arith.subf %135, %149 : vector<8x32xf32>
    %cst_40 = arith.constant 9.99999974E-6 : f32
    %151 = vector.broadcast %cst_40 : f32 to vector<8x1xf32>
    %152 = arith.addf %148, %151 : vector<8x1xf32>
    %153 = math.rsqrt %152 : vector<8x1xf32>
    %154 = vector.broadcast %153 : vector<8x1xf32> to vector<8x32xf32>
    %155 = arith.mulf %150, %154 : vector<8x32xf32>
    %156 = vector.broadcast %136 : vector<1x32xf32> to vector<8x32xf32>
    %157 = arith.mulf %155, %156 : vector<8x32xf32>
    %158 = vector.broadcast %137 : vector<1x32xf32> to vector<8x32xf32>
    %159 = arith.addf %157, %158 : vector<8x32xf32>
    %c80 = arith.constant 80 : index
    %c0_41 = arith.constant 0 : index
    %160 = vector.load %arg1[%c80, %c0_41] : memref<496x128xbf16, #tpu.memory_space<vmem>>, vector<32x128xbf16>
    %161 = arith.truncf %159 : vector<8x32xf32> to vector<8x32xbf16>
    %cst_42 = arith.constant dense<0.000000e+00> : vector<8x128xf32>
    %162 = tpu.matmul %161, %160, %cst_42 {dimension_numbers = #tpu.dot_dimension_numbers<[1], [0], [0], [1], [0, 0, 1, 1], [], []>} : vector<8x32xbf16>, vector<32x128xbf16>, vector<8x128xf32> -> vector<8x128xf32>
    %c12_43 = arith.constant 12 : index
    %c0_44 = arith.constant 0 : index
    %163 = vector.load %arg2[%c12_43, %c0_44] : memref<32x128xf32, #tpu.memory_space<vmem>>, vector<1x128xf32>
    %164 = vector.broadcast %163 : vector<1x128xf32> to vector<8x128xf32>
    %165 = arith.addf %162, %164 : vector<8x128xf32>
    %cst_45 = arith.constant 0.000000e+00 : f32
    %166 = vector.broadcast %cst_45 : f32 to vector<8x128xf32>
    %167 = arith.maximumf %165, %166 : vector<8x128xf32>
    %c112 = arith.constant 112 : index
    %c0_46 = arith.constant 0 : index
    %168 = vector.load %arg1[%c112, %c0_46] : memref<496x128xbf16, #tpu.memory_space<vmem>>, vector<128x32xbf16>
    %169 = arith.truncf %167 : vector<8x128xf32> to vector<8x128xbf16>
    %cst_47 = arith.constant dense<0.000000e+00> : vector<8x32xf32>
    %170 = tpu.matmul %169, %168, %cst_47 {dimension_numbers = #tpu.dot_dimension_numbers<[1], [0], [0], [1], [0, 0, 1, 1], [], []>} : vector<8x128xbf16>, vector<128x32xbf16>, vector<8x32xf32> -> vector<8x32xf32>
    %c13_48 = arith.constant 13 : index
    %c0_49 = arith.constant 0 : index
    %171 = vector.load %arg2[%c13_48, %c0_49] : memref<32x128xf32, #tpu.memory_space<vmem>>, vector<1x32xf32>
    %172 = vector.broadcast %171 : vector<1x32xf32> to vector<8x32xf32>
    %173 = arith.addf %170, %172 : vector<8x32xf32>
    %174 = arith.addf %159, %173 : vector<8x32xf32>
    %c14_50 = arith.constant 14 : index
    %c0_51 = arith.constant 0 : index
    %175 = vector.load %arg2[%c14_50, %c0_51] : memref<32x128xf32, #tpu.memory_space<vmem>>, vector<1x32xf32>
    %c15_52 = arith.constant 15 : index
    %c0_53 = arith.constant 0 : index
    %176 = vector.load %arg2[%c15_52, %c0_53] : memref<32x128xf32, #tpu.memory_space<vmem>>, vector<1x32xf32>
    %cst_54 = arith.constant dense<0.000000e+00> : vector<8xf32>
    %177 = vector.multi_reduction <add>, %174, %cst_54 [1] : vector<8x32xf32> to vector<8xf32>
    %178 = vector.shape_cast %177 : vector<8xf32> to vector<8x1xf32>
    %cst_55 = arith.constant 3.200000e+01 : f32
    %179 = vector.broadcast %cst_55 : f32 to vector<8x1xf32>
    %180 = arith.divf %178, %179 : vector<8x1xf32>
    %181 = vector.broadcast %180 : vector<8x1xf32> to vector<8x32xf32>
    %182 = arith.subf %174, %181 : vector<8x32xf32>
    %183 = arith.mulf %182, %182 : vector<8x32xf32>
    %cst_56 = arith.constant dense<0.000000e+00> : vector<8xf32>
    %184 = vector.multi_reduction <add>, %183, %cst_56 [1] : vector<8x32xf32> to vector<8xf32>
    %185 = vector.shape_cast %184 : vector<8xf32> to vector<8x1xf32>
    %cst_57 = arith.constant 3.200000e+01 : f32
    %186 = vector.broadcast %cst_57 : f32 to vector<8x1xf32>
    %187 = arith.divf %185, %186 : vector<8x1xf32>
    %188 = vector.broadcast %180 : vector<8x1xf32> to vector<8x32xf32>
    %189 = arith.subf %174, %188 : vector<8x32xf32>
    %cst_58 = arith.constant 9.99999974E-6 : f32
    %190 = vector.broadcast %cst_58 : f32 to vector<8x1xf32>
    %191 = arith.addf %187, %190 : vector<8x1xf32>
    %192 = math.rsqrt %191 : vector<8x1xf32>
    %193 = vector.broadcast %192 : vector<8x1xf32> to vector<8x32xf32>
    %194 = arith.mulf %189, %193 : vector<8x32xf32>
    %195 = vector.broadcast %175 : vector<1x32xf32> to vector<8x32xf32>
    %196 = arith.mulf %194, %195 : vector<8x32xf32>
    %197 = vector.broadcast %176 : vector<1x32xf32> to vector<8x32xf32>
    %198 = arith.addf %196, %197 : vector<8x32xf32>
    %c16_59 = arith.constant 16 : index
    %c0_60 = arith.constant 0 : index
    %199 = vector.load %arg3[%c16_59, %c0_60] : memref<480x128xbf16, #tpu.memory_space<vmem>>, vector<32x96xbf16>
    %200 = arith.truncf %101 : vector<8x32xf32> to vector<8x32xbf16>
    %cst_61 = arith.constant dense<0.000000e+00> : vector<8x96xf32>
    %201 = tpu.matmul %200, %199, %cst_61 {dimension_numbers = #tpu.dot_dimension_numbers<[1], [0], [0], [1], [0, 0, 1, 1], [], []>} : vector<8x32xbf16>, vector<32x96xbf16>, vector<8x96xf32> -> vector<8x96xf32>
    %c8_62 = arith.constant 8 : index
    %c0_63 = arith.constant 0 : index
    %202 = vector.load %arg4[%c8_62, %c0_63] : memref<32x128xf32, #tpu.memory_space<vmem>>, vector<1x96xf32>
    %203 = vector.broadcast %202 : vector<1x96xf32> to vector<8x96xf32>
    %204 = arith.addf %201, %203 : vector<8x96xf32>
    %205 = vector.extract_strided_slice %204 {offsets = [0, 0], sizes = [8, 32], strides = [1, 1]} : vector<8x96xf32> to vector<8x32xf32>
    %206 = vector.extract_strided_slice %204 {offsets = [0, 32], sizes = [8, 32], strides = [1, 1]} : vector<8x96xf32> to vector<8x32xf32>
    %207 = vector.extract_strided_slice %204 {offsets = [0, 64], sizes = [8, 32], strides = [1, 1]} : vector<8x96xf32> to vector<8x32xf32>
    %208 = arith.truncf %205 : vector<8x32xf32> to vector<8x32xbf16>
    %209 = arith.truncf %206 : vector<8x32xf32> to vector<8x32xbf16>
    %cst_64 = arith.constant dense<0.000000e+00> : vector<8x8xf32>
    %210 = tpu.matmul %208, %209, %cst_64 {dimension_numbers = #tpu.dot_dimension_numbers<[1], [1], [0], [0], [0, 0, 1, 0], [], []>} : vector<8x32xbf16>, vector<8x32xbf16>, vector<8x8xf32> -> vector<8x8xf32>
    %cst_65 = arith.constant 0.176776692 : f32
    %211 = vector.broadcast %cst_65 : f32 to vector<8x8xf32>
    %212 = arith.mulf %210, %211 : vector<8x8xf32>
    %cst_66 = arith.constant dense<0xFF800000> : vector<8xf32>
    %213 = vector.multi_reduction <maximumf>, %212, %cst_66 [1] : vector<8x8xf32> to vector<8xf32>
    %214 = vector.shape_cast %213 : vector<8xf32> to vector<8x1xf32>
    %215 = vector.broadcast %214 : vector<8x1xf32> to vector<8x8xf32>
    %216 = arith.subf %212, %215 : vector<8x8xf32>
    %217 = math.exp %216 : vector<8x8xf32>
    %cst_67 = arith.constant dense<0.000000e+00> : vector<8xf32>
    %218 = vector.multi_reduction <add>, %217, %cst_67 [1] : vector<8x8xf32> to vector<8xf32>
    %219 = vector.shape_cast %218 : vector<8xf32> to vector<8x1xf32>
    %220 = tpu.reciprocal %219 {approx = true} : vector<8x1xf32> -> vector<8x1xf32>
    %221 = vector.broadcast %220 : vector<8x1xf32> to vector<8x8xf32>
    %222 = arith.mulf %217, %221 : vector<8x8xf32>
    %223 = arith.truncf %222 : vector<8x8xf32> to vector<8x8xbf16>
    %224 = arith.truncf %207 : vector<8x32xf32> to vector<8x32xbf16>
    %cst_68 = arith.constant dense<0.000000e+00> : vector<8x32xf32>
    %225 = tpu.matmul %223, %224, %cst_68 {dimension_numbers = #tpu.dot_dimension_numbers<[1], [0], [0], [1], [0, 0, 1, 1], [], []>} : vector<8x8xbf16>, vector<8x32xbf16>, vector<8x32xf32> -> vector<8x32xf32>
    %c48_69 = arith.constant 48 : index
    %c0_70 = arith.constant 0 : index
    %226 = vector.load %arg3[%c48_69, %c0_70] : memref<480x128xbf16, #tpu.memory_space<vmem>>, vector<32x32xbf16>
    %227 = arith.truncf %225 : vector<8x32xf32> to vector<8x32xbf16>
    %cst_71 = arith.constant dense<0.000000e+00> : vector<8x32xf32>
    %228 = tpu.matmul %227, %226, %cst_71 {dimension_numbers = #tpu.dot_dimension_numbers<[1], [0], [0], [1], [0, 0, 1, 1], [], []>} : vector<8x32xbf16>, vector<32x32xbf16>, vector<8x32xf32> -> vector<8x32xf32>
    %c9_72 = arith.constant 9 : index
    %c0_73 = arith.constant 0 : index
    %229 = vector.load %arg4[%c9_72, %c0_73] : memref<32x128xf32, #tpu.memory_space<vmem>>, vector<1x32xf32>
    %230 = vector.broadcast %229 : vector<1x32xf32> to vector<8x32xf32>
    %231 = arith.addf %228, %230 : vector<8x32xf32>
    %232 = arith.addf %101, %231 : vector<8x32xf32>
    %c10_74 = arith.constant 10 : index
    %c0_75 = arith.constant 0 : index
    %233 = vector.load %arg4[%c10_74, %c0_75] : memref<32x128xf32, #tpu.memory_space<vmem>>, vector<1x32xf32>
    %c11_76 = arith.constant 11 : index
    %c0_77 = arith.constant 0 : index
    %234 = vector.load %arg4[%c11_76, %c0_77] : memref<32x128xf32, #tpu.memory_space<vmem>>, vector<1x32xf32>
    %cst_78 = arith.constant dense<0.000000e+00> : vector<8xf32>
    %235 = vector.multi_reduction <add>, %232, %cst_78 [1] : vector<8x32xf32> to vector<8xf32>
    %236 = vector.shape_cast %235 : vector<8xf32> to vector<8x1xf32>
    %cst_79 = arith.constant 3.200000e+01 : f32
    %237 = vector.broadcast %cst_79 : f32 to vector<8x1xf32>
    %238 = arith.divf %236, %237 : vector<8x1xf32>
    %239 = vector.broadcast %238 : vector<8x1xf32> to vector<8x32xf32>
    %240 = arith.subf %232, %239 : vector<8x32xf32>
    %241 = arith.mulf %240, %240 : vector<8x32xf32>
    %cst_80 = arith.constant dense<0.000000e+00> : vector<8xf32>
    %242 = vector.multi_reduction <add>, %241, %cst_80 [1] : vector<8x32xf32> to vector<8xf32>
    %243 = vector.shape_cast %242 : vector<8xf32> to vector<8x1xf32>
    %cst_81 = arith.constant 3.200000e+01 : f32
    %244 = vector.broadcast %cst_81 : f32 to vector<8x1xf32>
    %245 = arith.divf %243, %244 : vector<8x1xf32>
    %246 = vector.broadcast %238 : vector<8x1xf32> to vector<8x32xf32>
    %247 = arith.subf %232, %246 : vector<8x32xf32>
    %cst_82 = arith.constant 9.99999974E-6 : f32
    %248 = vector.broadcast %cst_82 : f32 to vector<8x1xf32>
    %249 = arith.addf %245, %248 : vector<8x1xf32>
    %250 = math.rsqrt %249 : vector<8x1xf32>
    %251 = vector.broadcast %250 : vector<8x1xf32> to vector<8x32xf32>
    %252 = arith.mulf %247, %251 : vector<8x32xf32>
    %253 = vector.broadcast %233 : vector<1x32xf32> to vector<8x32xf32>
    %254 = arith.mulf %252, %253 : vector<8x32xf32>
    %255 = vector.broadcast %234 : vector<1x32xf32> to vector<8x32xf32>
    %256 = arith.addf %254, %255 : vector<8x32xf32>
    %c80_83 = arith.constant 80 : index
    %c0_84 = arith.constant 0 : index
    %257 = vector.load %arg3[%c80_83, %c0_84] : memref<480x128xbf16, #tpu.memory_space<vmem>>, vector<32x128xbf16>
    %258 = arith.truncf %256 : vector<8x32xf32> to vector<8x32xbf16>
    %cst_85 = arith.constant dense<0.000000e+00> : vector<8x128xf32>
    %259 = tpu.matmul %258, %257, %cst_85 {dimension_numbers = #tpu.dot_dimension_numbers<[1], [0], [0], [1], [0, 0, 1, 1], [], []>} : vector<8x32xbf16>, vector<32x128xbf16>, vector<8x128xf32> -> vector<8x128xf32>
    %c12_86 = arith.constant 12 : index
    %c0_87 = arith.constant 0 : index
    %260 = vector.load %arg4[%c12_86, %c0_87] : memref<32x128xf32, #tpu.memory_space<vmem>>, vector<1x128xf32>
    %261 = vector.broadcast %260 : vector<1x128xf32> to vector<8x128xf32>
    %262 = arith.addf %259, %261 : vector<8x128xf32>
    %cst_88 = arith.constant 0.000000e+00 : f32
    %263 = vector.broadcast %cst_88 : f32 to vector<8x128xf32>
    %264 = arith.maximumf %262, %263 : vector<8x128xf32>
    %c112_89 = arith.constant 112 : index
    %c0_90 = arith.constant 0 : index
    %265 = vector.load %arg3[%c112_89, %c0_90] : memref<480x128xbf16, #tpu.memory_space<vmem>>, vector<128x32xbf16>
    %266 = arith.truncf %264 : vector<8x128xf32> to vector<8x128xbf16>
    %cst_91 = arith.constant dense<0.000000e+00> : vector<8x32xf32>
    %267 = tpu.matmul %266, %265, %cst_91 {dimension_numbers = #tpu.dot_dimension_numbers<[1], [0], [0], [1], [0, 0, 1, 1], [], []>} : vector<8x128xbf16>, vector<128x32xbf16>, vector<8x32xf32> -> vector<8x32xf32>
    %c13_92 = arith.constant 13 : index
    %c0_93 = arith.constant 0 : index
    %268 = vector.load %arg4[%c13_92, %c0_93] : memref<32x128xf32, #tpu.memory_space<vmem>>, vector<1x32xf32>
    %269 = vector.broadcast %268 : vector<1x32xf32> to vector<8x32xf32>
    %270 = arith.addf %267, %269 : vector<8x32xf32>
    %271 = arith.addf %256, %270 : vector<8x32xf32>
    %c14_94 = arith.constant 14 : index
    %c0_95 = arith.constant 0 : index
    %272 = vector.load %arg4[%c14_94, %c0_95] : memref<32x128xf32, #tpu.memory_space<vmem>>, vector<1x32xf32>
    %c15_96 = arith.constant 15 : index
    %c0_97 = arith.constant 0 : index
    %273 = vector.load %arg4[%c15_96, %c0_97] : memref<32x128xf32, #tpu.memory_space<vmem>>, vector<1x32xf32>
    %cst_98 = arith.constant dense<0.000000e+00> : vector<8xf32>
    %274 = vector.multi_reduction <add>, %271, %cst_98 [1] : vector<8x32xf32> to vector<8xf32>
    %275 = vector.shape_cast %274 : vector<8xf32> to vector<8x1xf32>
    %cst_99 = arith.constant 3.200000e+01 : f32
    %276 = vector.broadcast %cst_99 : f32 to vector<8x1xf32>
    %277 = arith.divf %275, %276 : vector<8x1xf32>
    %278 = vector.broadcast %277 : vector<8x1xf32> to vector<8x32xf32>
    %279 = arith.subf %271, %278 : vector<8x32xf32>
    %280 = arith.mulf %279, %279 : vector<8x32xf32>
    %cst_100 = arith.constant dense<0.000000e+00> : vector<8xf32>
    %281 = vector.multi_reduction <add>, %280, %cst_100 [1] : vector<8x32xf32> to vector<8xf32>
    %282 = vector.shape_cast %281 : vector<8xf32> to vector<8x1xf32>
    %cst_101 = arith.constant 3.200000e+01 : f32
    %283 = vector.broadcast %cst_101 : f32 to vector<8x1xf32>
    %284 = arith.divf %282, %283 : vector<8x1xf32>
    %285 = vector.broadcast %277 : vector<8x1xf32> to vector<8x32xf32>
    %286 = arith.subf %271, %285 : vector<8x32xf32>
    %cst_102 = arith.constant 9.99999974E-6 : f32
    %287 = vector.broadcast %cst_102 : f32 to vector<8x1xf32>
    %288 = arith.addf %284, %287 : vector<8x1xf32>
    %289 = math.rsqrt %288 : vector<8x1xf32>
    %290 = vector.broadcast %289 : vector<8x1xf32> to vector<8x32xf32>
    %291 = arith.mulf %286, %290 : vector<8x32xf32>
    %292 = vector.broadcast %272 : vector<1x32xf32> to vector<8x32xf32>
    %293 = arith.mulf %291, %292 : vector<8x32xf32>
    %294 = vector.broadcast %273 : vector<1x32xf32> to vector<8x32xf32>
    %295 = arith.addf %293, %294 : vector<8x32xf32>
    %c240 = arith.constant 240 : index
    %c0_103 = arith.constant 0 : index
    %296 = vector.load %arg1[%c240, %c0_103] : memref<496x128xbf16, #tpu.memory_space<vmem>>, vector<32x96xbf16>
    %297 = arith.truncf %198 : vector<8x32xf32> to vector<8x32xbf16>
    %cst_104 = arith.constant dense<0.000000e+00> : vector<8x96xf32>
    %298 = tpu.matmul %297, %296, %cst_104 {dimension_numbers = #tpu.dot_dimension_numbers<[1], [0], [0], [1], [0, 0, 1, 1], [], []>} : vector<8x32xbf16>, vector<32x96xbf16>, vector<8x96xf32> -> vector<8x96xf32>
    %c16_105 = arith.constant 16 : index
    %c0_106 = arith.constant 0 : index
    %299 = vector.load %arg2[%c16_105, %c0_106] : memref<32x128xf32, #tpu.memory_space<vmem>>, vector<1x96xf32>
    %300 = vector.broadcast %299 : vector<1x96xf32> to vector<8x96xf32>
    %301 = arith.addf %298, %300 : vector<8x96xf32>
    %302 = vector.extract_strided_slice %301 {offsets = [0, 0], sizes = [8, 32], strides = [1, 1]} : vector<8x96xf32> to vector<8x32xf32>
    %303 = vector.extract_strided_slice %301 {offsets = [0, 32], sizes = [8, 32], strides = [1, 1]} : vector<8x96xf32> to vector<8x32xf32>
    %304 = vector.extract_strided_slice %301 {offsets = [0, 64], sizes = [8, 32], strides = [1, 1]} : vector<8x96xf32> to vector<8x32xf32>
    %305 = arith.truncf %302 : vector<8x32xf32> to vector<8x32xbf16>
    %306 = arith.truncf %303 : vector<8x32xf32> to vector<8x32xbf16>
    %cst_107 = arith.constant dense<0.000000e+00> : vector<8x8xf32>
    %307 = tpu.matmul %305, %306, %cst_107 {dimension_numbers = #tpu.dot_dimension_numbers<[1], [1], [0], [0], [0, 0, 1, 0], [], []>} : vector<8x32xbf16>, vector<8x32xbf16>, vector<8x8xf32> -> vector<8x8xf32>
    %cst_108 = arith.constant 0.176776692 : f32
    %308 = vector.broadcast %cst_108 : f32 to vector<8x8xf32>
    %309 = arith.mulf %307, %308 : vector<8x8xf32>
    %cst_109 = arith.constant dense<0xFF800000> : vector<8xf32>
    %310 = vector.multi_reduction <maximumf>, %309, %cst_109 [1] : vector<8x8xf32> to vector<8xf32>
    %311 = vector.shape_cast %310 : vector<8xf32> to vector<8x1xf32>
    %312 = vector.broadcast %311 : vector<8x1xf32> to vector<8x8xf32>
    %313 = arith.subf %309, %312 : vector<8x8xf32>
    %314 = math.exp %313 : vector<8x8xf32>
    %cst_110 = arith.constant dense<0.000000e+00> : vector<8xf32>
    %315 = vector.multi_reduction <add>, %314, %cst_110 [1] : vector<8x8xf32> to vector<8xf32>
    %316 = vector.shape_cast %315 : vector<8xf32> to vector<8x1xf32>
    %317 = tpu.reciprocal %316 {approx = true} : vector<8x1xf32> -> vector<8x1xf32>
    %318 = vector.broadcast %317 : vector<8x1xf32> to vector<8x8xf32>
    %319 = arith.mulf %314, %318 : vector<8x8xf32>
    %320 = arith.truncf %319 : vector<8x8xf32> to vector<8x8xbf16>
    %321 = arith.truncf %304 : vector<8x32xf32> to vector<8x32xbf16>
    %cst_111 = arith.constant dense<0.000000e+00> : vector<8x32xf32>
    %322 = tpu.matmul %320, %321, %cst_111 {dimension_numbers = #tpu.dot_dimension_numbers<[1], [0], [0], [1], [0, 0, 1, 1], [], []>} : vector<8x8xbf16>, vector<8x32xbf16>, vector<8x32xf32> -> vector<8x32xf32>
    %c272 = arith.constant 272 : index
    %c0_112 = arith.constant 0 : index
    %323 = vector.load %arg1[%c272, %c0_112] : memref<496x128xbf16, #tpu.memory_space<vmem>>, vector<32x32xbf16>
    %324 = arith.truncf %322 : vector<8x32xf32> to vector<8x32xbf16>
    %cst_113 = arith.constant dense<0.000000e+00> : vector<8x32xf32>
    %325 = tpu.matmul %324, %323, %cst_113 {dimension_numbers = #tpu.dot_dimension_numbers<[1], [0], [0], [1], [0, 0, 1, 1], [], []>} : vector<8x32xbf16>, vector<32x32xbf16>, vector<8x32xf32> -> vector<8x32xf32>
    %c17 = arith.constant 17 : index
    %c0_114 = arith.constant 0 : index
    %326 = vector.load %arg2[%c17, %c0_114] : memref<32x128xf32, #tpu.memory_space<vmem>>, vector<1x32xf32>
    %327 = vector.broadcast %326 : vector<1x32xf32> to vector<8x32xf32>
    %328 = arith.addf %325, %327 : vector<8x32xf32>
    %329 = arith.addf %198, %328 : vector<8x32xf32>
    %c18 = arith.constant 18 : index
    %c0_115 = arith.constant 0 : index
    %330 = vector.load %arg2[%c18, %c0_115] : memref<32x128xf32, #tpu.memory_space<vmem>>, vector<1x32xf32>
    %c19 = arith.constant 19 : index
    %c0_116 = arith.constant 0 : index
    %331 = vector.load %arg2[%c19, %c0_116] : memref<32x128xf32, #tpu.memory_space<vmem>>, vector<1x32xf32>
    %cst_117 = arith.constant dense<0.000000e+00> : vector<8xf32>
    %332 = vector.multi_reduction <add>, %329, %cst_117 [1] : vector<8x32xf32> to vector<8xf32>
    %333 = vector.shape_cast %332 : vector<8xf32> to vector<8x1xf32>
    %cst_118 = arith.constant 3.200000e+01 : f32
    %334 = vector.broadcast %cst_118 : f32 to vector<8x1xf32>
    %335 = arith.divf %333, %334 : vector<8x1xf32>
    %336 = vector.broadcast %335 : vector<8x1xf32> to vector<8x32xf32>
    %337 = arith.subf %329, %336 : vector<8x32xf32>
    %338 = arith.mulf %337, %337 : vector<8x32xf32>
    %cst_119 = arith.constant dense<0.000000e+00> : vector<8xf32>
    %339 = vector.multi_reduction <add>, %338, %cst_119 [1] : vector<8x32xf32> to vector<8xf32>
    %340 = vector.shape_cast %339 : vector<8xf32> to vector<8x1xf32>
    %cst_120 = arith.constant 3.200000e+01 : f32
    %341 = vector.broadcast %cst_120 : f32 to vector<8x1xf32>
    %342 = arith.divf %340, %341 : vector<8x1xf32>
    %343 = vector.broadcast %335 : vector<8x1xf32> to vector<8x32xf32>
    %344 = arith.subf %329, %343 : vector<8x32xf32>
    %cst_121 = arith.constant 9.99999974E-6 : f32
    %345 = vector.broadcast %cst_121 : f32 to vector<8x1xf32>
    %346 = arith.addf %342, %345 : vector<8x1xf32>
    %347 = math.rsqrt %346 : vector<8x1xf32>
    %348 = vector.broadcast %347 : vector<8x1xf32> to vector<8x32xf32>
    %349 = arith.mulf %344, %348 : vector<8x32xf32>
    %350 = vector.broadcast %330 : vector<1x32xf32> to vector<8x32xf32>
    %351 = arith.mulf %349, %350 : vector<8x32xf32>
    %352 = vector.broadcast %331 : vector<1x32xf32> to vector<8x32xf32>
    %353 = arith.addf %351, %352 : vector<8x32xf32>
    %c304 = arith.constant 304 : index
    %c0_122 = arith.constant 0 : index
    %354 = vector.load %arg1[%c304, %c0_122] : memref<496x128xbf16, #tpu.memory_space<vmem>>, vector<32x128xbf16>
    %355 = arith.truncf %353 : vector<8x32xf32> to vector<8x32xbf16>
    %cst_123 = arith.constant dense<0.000000e+00> : vector<8x128xf32>
    %356 = tpu.matmul %355, %354, %cst_123 {dimension_numbers = #tpu.dot_dimension_numbers<[1], [0], [0], [1], [0, 0, 1, 1], [], []>} : vector<8x32xbf16>, vector<32x128xbf16>, vector<8x128xf32> -> vector<8x128xf32>
    %c20 = arith.constant 20 : index
    %c0_124 = arith.constant 0 : index
    %357 = vector.load %arg2[%c20, %c0_124] : memref<32x128xf32, #tpu.memory_space<vmem>>, vector<1x128xf32>
    %358 = vector.broadcast %357 : vector<1x128xf32> to vector<8x128xf32>
    %359 = arith.addf %356, %358 : vector<8x128xf32>
    %cst_125 = arith.constant 0.000000e+00 : f32
    %360 = vector.broadcast %cst_125 : f32 to vector<8x128xf32>
    %361 = arith.maximumf %359, %360 : vector<8x128xf32>
    %c336 = arith.constant 336 : index
    %c0_126 = arith.constant 0 : index
    %362 = vector.load %arg1[%c336, %c0_126] : memref<496x128xbf16, #tpu.memory_space<vmem>>, vector<128x32xbf16>
    %363 = arith.truncf %361 : vector<8x128xf32> to vector<8x128xbf16>
    %cst_127 = arith.constant dense<0.000000e+00> : vector<8x32xf32>
    %364 = tpu.matmul %363, %362, %cst_127 {dimension_numbers = #tpu.dot_dimension_numbers<[1], [0], [0], [1], [0, 0, 1, 1], [], []>} : vector<8x128xbf16>, vector<128x32xbf16>, vector<8x32xf32> -> vector<8x32xf32>
    %c21 = arith.constant 21 : index
    %c0_128 = arith.constant 0 : index
    %365 = vector.load %arg2[%c21, %c0_128] : memref<32x128xf32, #tpu.memory_space<vmem>>, vector<1x32xf32>
    %366 = vector.broadcast %365 : vector<1x32xf32> to vector<8x32xf32>
    %367 = arith.addf %364, %366 : vector<8x32xf32>
    %368 = arith.addf %353, %367 : vector<8x32xf32>
    %c22 = arith.constant 22 : index
    %c0_129 = arith.constant 0 : index
    %369 = vector.load %arg2[%c22, %c0_129] : memref<32x128xf32, #tpu.memory_space<vmem>>, vector<1x32xf32>
    %c23 = arith.constant 23 : index
    %c0_130 = arith.constant 0 : index
    %370 = vector.load %arg2[%c23, %c0_130] : memref<32x128xf32, #tpu.memory_space<vmem>>, vector<1x32xf32>
    %cst_131 = arith.constant dense<0.000000e+00> : vector<8xf32>
    %371 = vector.multi_reduction <add>, %368, %cst_131 [1] : vector<8x32xf32> to vector<8xf32>
    %372 = vector.shape_cast %371 : vector<8xf32> to vector<8x1xf32>
    %cst_132 = arith.constant 3.200000e+01 : f32
    %373 = vector.broadcast %cst_132 : f32 to vector<8x1xf32>
    %374 = arith.divf %372, %373 : vector<8x1xf32>
    %375 = vector.broadcast %374 : vector<8x1xf32> to vector<8x32xf32>
    %376 = arith.subf %368, %375 : vector<8x32xf32>
    %377 = arith.mulf %376, %376 : vector<8x32xf32>
    %cst_133 = arith.constant dense<0.000000e+00> : vector<8xf32>
    %378 = vector.multi_reduction <add>, %377, %cst_133 [1] : vector<8x32xf32> to vector<8xf32>
    %379 = vector.shape_cast %378 : vector<8xf32> to vector<8x1xf32>
    %cst_134 = arith.constant 3.200000e+01 : f32
    %380 = vector.broadcast %cst_134 : f32 to vector<8x1xf32>
    %381 = arith.divf %379, %380 : vector<8x1xf32>
    %382 = vector.broadcast %374 : vector<8x1xf32> to vector<8x32xf32>
    %383 = arith.subf %368, %382 : vector<8x32xf32>
    %cst_135 = arith.constant 9.99999974E-6 : f32
    %384 = vector.broadcast %cst_135 : f32 to vector<8x1xf32>
    %385 = arith.addf %381, %384 : vector<8x1xf32>
    %386 = math.rsqrt %385 : vector<8x1xf32>
    %387 = vector.broadcast %386 : vector<8x1xf32> to vector<8x32xf32>
    %388 = arith.mulf %383, %387 : vector<8x32xf32>
    %389 = vector.broadcast %369 : vector<1x32xf32> to vector<8x32xf32>
    %390 = arith.mulf %388, %389 : vector<8x32xf32>
    %391 = vector.broadcast %370 : vector<1x32xf32> to vector<8x32xf32>
    %392 = arith.addf %390, %391 : vector<8x32xf32>
    %c240_136 = arith.constant 240 : index
    %c0_137 = arith.constant 0 : index
    %393 = vector.load %arg3[%c240_136, %c0_137] : memref<480x128xbf16, #tpu.memory_space<vmem>>, vector<32x96xbf16>
    %394 = arith.truncf %295 : vector<8x32xf32> to vector<8x32xbf16>
    %cst_138 = arith.constant dense<0.000000e+00> : vector<8x96xf32>
    %395 = tpu.matmul %394, %393, %cst_138 {dimension_numbers = #tpu.dot_dimension_numbers<[1], [0], [0], [1], [0, 0, 1, 1], [], []>} : vector<8x32xbf16>, vector<32x96xbf16>, vector<8x96xf32> -> vector<8x96xf32>
    %c16_139 = arith.constant 16 : index
    %c0_140 = arith.constant 0 : index
    %396 = vector.load %arg4[%c16_139, %c0_140] : memref<32x128xf32, #tpu.memory_space<vmem>>, vector<1x96xf32>
    %397 = vector.broadcast %396 : vector<1x96xf32> to vector<8x96xf32>
    %398 = arith.addf %395, %397 : vector<8x96xf32>
    %399 = vector.extract_strided_slice %398 {offsets = [0, 0], sizes = [8, 32], strides = [1, 1]} : vector<8x96xf32> to vector<8x32xf32>
    %400 = vector.extract_strided_slice %398 {offsets = [0, 32], sizes = [8, 32], strides = [1, 1]} : vector<8x96xf32> to vector<8x32xf32>
    %401 = vector.extract_strided_slice %398 {offsets = [0, 64], sizes = [8, 32], strides = [1, 1]} : vector<8x96xf32> to vector<8x32xf32>
    %402 = arith.truncf %399 : vector<8x32xf32> to vector<8x32xbf16>
    %403 = arith.truncf %400 : vector<8x32xf32> to vector<8x32xbf16>
    %cst_141 = arith.constant dense<0.000000e+00> : vector<8x8xf32>
    %404 = tpu.matmul %402, %403, %cst_141 {dimension_numbers = #tpu.dot_dimension_numbers<[1], [1], [0], [0], [0, 0, 1, 0], [], []>} : vector<8x32xbf16>, vector<8x32xbf16>, vector<8x8xf32> -> vector<8x8xf32>
    %cst_142 = arith.constant 0.176776692 : f32
    %405 = vector.broadcast %cst_142 : f32 to vector<8x8xf32>
    %406 = arith.mulf %404, %405 : vector<8x8xf32>
    %cst_143 = arith.constant dense<0xFF800000> : vector<8xf32>
    %407 = vector.multi_reduction <maximumf>, %406, %cst_143 [1] : vector<8x8xf32> to vector<8xf32>
    %408 = vector.shape_cast %407 : vector<8xf32> to vector<8x1xf32>
    %409 = vector.broadcast %408 : vector<8x1xf32> to vector<8x8xf32>
    %410 = arith.subf %406, %409 : vector<8x8xf32>
    %411 = math.exp %410 : vector<8x8xf32>
    %cst_144 = arith.constant dense<0.000000e+00> : vector<8xf32>
    %412 = vector.multi_reduction <add>, %411, %cst_144 [1] : vector<8x8xf32> to vector<8xf32>
    %413 = vector.shape_cast %412 : vector<8xf32> to vector<8x1xf32>
    %414 = tpu.reciprocal %413 {approx = true} : vector<8x1xf32> -> vector<8x1xf32>
    %415 = vector.broadcast %414 : vector<8x1xf32> to vector<8x8xf32>
    %416 = arith.mulf %411, %415 : vector<8x8xf32>
    %417 = arith.truncf %416 : vector<8x8xf32> to vector<8x8xbf16>
    %418 = arith.truncf %401 : vector<8x32xf32> to vector<8x32xbf16>
    %cst_145 = arith.constant dense<0.000000e+00> : vector<8x32xf32>
    %419 = tpu.matmul %417, %418, %cst_145 {dimension_numbers = #tpu.dot_dimension_numbers<[1], [0], [0], [1], [0, 0, 1, 1], [], []>} : vector<8x8xbf16>, vector<8x32xbf16>, vector<8x32xf32> -> vector<8x32xf32>
    %c272_146 = arith.constant 272 : index
    %c0_147 = arith.constant 0 : index
    %420 = vector.load %arg3[%c272_146, %c0_147] : memref<480x128xbf16, #tpu.memory_space<vmem>>, vector<32x32xbf16>
    %421 = arith.truncf %419 : vector<8x32xf32> to vector<8x32xbf16>
    %cst_148 = arith.constant dense<0.000000e+00> : vector<8x32xf32>
    %422 = tpu.matmul %421, %420, %cst_148 {dimension_numbers = #tpu.dot_dimension_numbers<[1], [0], [0], [1], [0, 0, 1, 1], [], []>} : vector<8x32xbf16>, vector<32x32xbf16>, vector<8x32xf32> -> vector<8x32xf32>
    %c17_149 = arith.constant 17 : index
    %c0_150 = arith.constant 0 : index
    %423 = vector.load %arg4[%c17_149, %c0_150] : memref<32x128xf32, #tpu.memory_space<vmem>>, vector<1x32xf32>
    %424 = vector.broadcast %423 : vector<1x32xf32> to vector<8x32xf32>
    %425 = arith.addf %422, %424 : vector<8x32xf32>
    %426 = arith.addf %295, %425 : vector<8x32xf32>
    %c18_151 = arith.constant 18 : index
    %c0_152 = arith.constant 0 : index
    %427 = vector.load %arg4[%c18_151, %c0_152] : memref<32x128xf32, #tpu.memory_space<vmem>>, vector<1x32xf32>
    %c19_153 = arith.constant 19 : index
    %c0_154 = arith.constant 0 : index
    %428 = vector.load %arg4[%c19_153, %c0_154] : memref<32x128xf32, #tpu.memory_space<vmem>>, vector<1x32xf32>
    %cst_155 = arith.constant dense<0.000000e+00> : vector<8xf32>
    %429 = vector.multi_reduction <add>, %426, %cst_155 [1] : vector<8x32xf32> to vector<8xf32>
    %430 = vector.shape_cast %429 : vector<8xf32> to vector<8x1xf32>
    %cst_156 = arith.constant 3.200000e+01 : f32
    %431 = vector.broadcast %cst_156 : f32 to vector<8x1xf32>
    %432 = arith.divf %430, %431 : vector<8x1xf32>
    %433 = vector.broadcast %432 : vector<8x1xf32> to vector<8x32xf32>
    %434 = arith.subf %426, %433 : vector<8x32xf32>
    %435 = arith.mulf %434, %434 : vector<8x32xf32>
    %cst_157 = arith.constant dense<0.000000e+00> : vector<8xf32>
    %436 = vector.multi_reduction <add>, %435, %cst_157 [1] : vector<8x32xf32> to vector<8xf32>
    %437 = vector.shape_cast %436 : vector<8xf32> to vector<8x1xf32>
    %cst_158 = arith.constant 3.200000e+01 : f32
    %438 = vector.broadcast %cst_158 : f32 to vector<8x1xf32>
    %439 = arith.divf %437, %438 : vector<8x1xf32>
    %440 = vector.broadcast %432 : vector<8x1xf32> to vector<8x32xf32>
    %441 = arith.subf %426, %440 : vector<8x32xf32>
    %cst_159 = arith.constant 9.99999974E-6 : f32
    %442 = vector.broadcast %cst_159 : f32 to vector<8x1xf32>
    %443 = arith.addf %439, %442 : vector<8x1xf32>
    %444 = math.rsqrt %443 : vector<8x1xf32>
    %445 = vector.broadcast %444 : vector<8x1xf32> to vector<8x32xf32>
    %446 = arith.mulf %441, %445 : vector<8x32xf32>
    %447 = vector.broadcast %427 : vector<1x32xf32> to vector<8x32xf32>
    %448 = arith.mulf %446, %447 : vector<8x32xf32>
    %449 = vector.broadcast %428 : vector<1x32xf32> to vector<8x32xf32>
    %450 = arith.addf %448, %449 : vector<8x32xf32>
    %c304_160 = arith.constant 304 : index
    %c0_161 = arith.constant 0 : index
    %451 = vector.load %arg3[%c304_160, %c0_161] : memref<480x128xbf16, #tpu.memory_space<vmem>>, vector<32x128xbf16>
    %452 = arith.truncf %450 : vector<8x32xf32> to vector<8x32xbf16>
    %cst_162 = arith.constant dense<0.000000e+00> : vector<8x128xf32>
    %453 = tpu.matmul %452, %451, %cst_162 {dimension_numbers = #tpu.dot_dimension_numbers<[1], [0], [0], [1], [0, 0, 1, 1], [], []>} : vector<8x32xbf16>, vector<32x128xbf16>, vector<8x128xf32> -> vector<8x128xf32>
    %c20_163 = arith.constant 20 : index
    %c0_164 = arith.constant 0 : index
    %454 = vector.load %arg4[%c20_163, %c0_164] : memref<32x128xf32, #tpu.memory_space<vmem>>, vector<1x128xf32>
    %455 = vector.broadcast %454 : vector<1x128xf32> to vector<8x128xf32>
    %456 = arith.addf %453, %455 : vector<8x128xf32>
    %cst_165 = arith.constant 0.000000e+00 : f32
    %457 = vector.broadcast %cst_165 : f32 to vector<8x128xf32>
    %458 = arith.maximumf %456, %457 : vector<8x128xf32>
    %c336_166 = arith.constant 336 : index
    %c0_167 = arith.constant 0 : index
    %459 = vector.load %arg3[%c336_166, %c0_167] : memref<480x128xbf16, #tpu.memory_space<vmem>>, vector<128x32xbf16>
    %460 = arith.truncf %458 : vector<8x128xf32> to vector<8x128xbf16>
    %cst_168 = arith.constant dense<0.000000e+00> : vector<8x32xf32>
    %461 = tpu.matmul %460, %459, %cst_168 {dimension_numbers = #tpu.dot_dimension_numbers<[1], [0], [0], [1], [0, 0, 1, 1], [], []>} : vector<8x128xbf16>, vector<128x32xbf16>, vector<8x32xf32> -> vector<8x32xf32>
    %c21_169 = arith.constant 21 : index
    %c0_170 = arith.constant 0 : index
    %462 = vector.load %arg4[%c21_169, %c0_170] : memref<32x128xf32, #tpu.memory_space<vmem>>, vector<1x32xf32>
    %463 = vector.broadcast %462 : vector<1x32xf32> to vector<8x32xf32>
    %464 = arith.addf %461, %463 : vector<8x32xf32>
    %465 = arith.addf %450, %464 : vector<8x32xf32>
    %c22_171 = arith.constant 22 : index
    %c0_172 = arith.constant 0 : index
    %466 = vector.load %arg4[%c22_171, %c0_172] : memref<32x128xf32, #tpu.memory_space<vmem>>, vector<1x32xf32>
    %c23_173 = arith.constant 23 : index
    %c0_174 = arith.constant 0 : index
    %467 = vector.load %arg4[%c23_173, %c0_174] : memref<32x128xf32, #tpu.memory_space<vmem>>, vector<1x32xf32>
    %cst_175 = arith.constant dense<0.000000e+00> : vector<8xf32>
    %468 = vector.multi_reduction <add>, %465, %cst_175 [1] : vector<8x32xf32> to vector<8xf32>
    %469 = vector.shape_cast %468 : vector<8xf32> to vector<8x1xf32>
    %cst_176 = arith.constant 3.200000e+01 : f32
    %470 = vector.broadcast %cst_176 : f32 to vector<8x1xf32>
    %471 = arith.divf %469, %470 : vector<8x1xf32>
    %472 = vector.broadcast %471 : vector<8x1xf32> to vector<8x32xf32>
    %473 = arith.subf %465, %472 : vector<8x32xf32>
    %474 = arith.mulf %473, %473 : vector<8x32xf32>
    %cst_177 = arith.constant dense<0.000000e+00> : vector<8xf32>
    %475 = vector.multi_reduction <add>, %474, %cst_177 [1] : vector<8x32xf32> to vector<8xf32>
    %476 = vector.shape_cast %475 : vector<8xf32> to vector<8x1xf32>
    %cst_178 = arith.constant 3.200000e+01 : f32
    %477 = vector.broadcast %cst_178 : f32 to vector<8x1xf32>
    %478 = arith.divf %476, %477 : vector<8x1xf32>
    %479 = vector.broadcast %471 : vector<8x1xf32> to vector<8x32xf32>
    %480 = arith.subf %465, %479 : vector<8x32xf32>
    %cst_179 = arith.constant 9.99999974E-6 : f32
    %481 = vector.broadcast %cst_179 : f32 to vector<8x1xf32>
    %482 = arith.addf %478, %481 : vector<8x1xf32>
    %483 = math.rsqrt %482 : vector<8x1xf32>
    %484 = vector.broadcast %483 : vector<8x1xf32> to vector<8x32xf32>
    %485 = arith.mulf %480, %484 : vector<8x32xf32>
    %486 = vector.broadcast %466 : vector<1x32xf32> to vector<8x32xf32>
    %487 = arith.mulf %485, %486 : vector<8x32xf32>
    %488 = vector.broadcast %467 : vector<1x32xf32> to vector<8x32xf32>
    %489 = arith.addf %487, %488 : vector<8x32xf32>
    %490 = vector.extract_strided_slice %392 {offsets = [7, 0], sizes = [1, 32], strides = [1, 1]} : vector<8x32xf32> to vector<1x32xf32>
    %c464 = arith.constant 464 : index
    %c0_180 = arith.constant 0 : index
    %491 = vector.load %arg1[%c464, %c0_180] : memref<496x128xbf16, #tpu.memory_space<vmem>>, vector<32x32xbf16>
    %492 = arith.truncf %490 : vector<1x32xf32> to vector<1x32xbf16>
    %cst_181 = arith.constant dense<0.000000e+00> : vector<1x32xf32>
    %493 = tpu.matmul %492, %491, %cst_181 {dimension_numbers = #tpu.dot_dimension_numbers<[1], [0], [0], [1], [0, 0, 1, 1], [], []>} : vector<1x32xbf16>, vector<32x32xbf16>, vector<1x32xf32> -> vector<1x32xf32>
    %c24 = arith.constant 24 : index
    %c0_182 = arith.constant 0 : index
    %494 = vector.load %arg2[%c24, %c0_182] : memref<32x128xf32, #tpu.memory_space<vmem>>, vector<1x32xf32>
    %495 = arith.addf %493, %494 : vector<1x32xf32>
    %496 = arith.truncf %495 : vector<1x32xf32> to vector<1x32xbf16>
    %497 = arith.truncf %489 : vector<8x32xf32> to vector<8x32xbf16>
    %cst_183 = arith.constant dense<0.000000e+00> : vector<1x8xf32>
    %498 = tpu.matmul %496, %497, %cst_183 {dimension_numbers = #tpu.dot_dimension_numbers<[1], [1], [0], [0], [0, 0, 1, 0], [], []>} : vector<1x32xbf16>, vector<8x32xbf16>, vector<1x8xf32> -> vector<1x8xf32>
    %c464_184 = arith.constant 464 : index
    %c0_185 = arith.constant 0 : index
    %499 = vector.load %arg3[%c464_184, %c0_185] : memref<480x128xbf16, #tpu.memory_space<vmem>>, vector<8x8xbf16>
    %500 = arith.truncf %498 : vector<1x8xf32> to vector<1x8xbf16>
    %cst_186 = arith.constant dense<0.000000e+00> : vector<1x8xf32>
    %501 = tpu.matmul %500, %499, %cst_186 {dimension_numbers = #tpu.dot_dimension_numbers<[1], [0], [0], [1], [0, 0, 1, 1], [], []>} : vector<1x8xbf16>, vector<8x8xbf16>, vector<1x8xf32> -> vector<1x8xf32>
    %cst_187 = arith.constant dense<0.000000e+00> : vector<1xf32>
    %502 = vector.multi_reduction <add>, %495, %cst_187 [1] : vector<1x32xf32> to vector<1xf32>
    %503 = vector.shape_cast %502 : vector<1xf32> to vector<1x1xf32>
    %c24_188 = arith.constant 24 : index
    %c0_189 = arith.constant 0 : index
    %504 = vector.load %arg4[%c24_188, %c0_189] : memref<32x128xf32, #tpu.memory_space<vmem>>, vector<1x8xf32>
    %505 = vector.broadcast %503 : vector<1x1xf32> to vector<1x8xf32>
    %506 = arith.mulf %505, %504 : vector<1x8xf32>
    %507 = arith.addf %501, %506 : vector<1x8xf32>
    %cst_190 = arith.constant dense<0xFF800000> : vector<1xf32>
    %508 = vector.multi_reduction <maximumf>, %507, %cst_190 [1] : vector<1x8xf32> to vector<1xf32>
    %509 = vector.shape_cast %508 : vector<1xf32> to vector<1x1xf32>
    %510 = vector.broadcast %509 : vector<1x1xf32> to vector<1x8xf32>
    %511 = arith.subf %507, %510 : vector<1x8xf32>
    %512 = math.exp %511 : vector<1x8xf32>
    %cst_191 = arith.constant dense<0.000000e+00> : vector<1xf32>
    %513 = vector.multi_reduction <add>, %512, %cst_191 [1] : vector<1x8xf32> to vector<1xf32>
    %514 = vector.shape_cast %513 : vector<1xf32> to vector<1x1xf32>
    %515 = vector.broadcast %514 : vector<1x1xf32> to vector<1x8xf32>
    %516 = arith.divf %512, %515 : vector<1x8xf32>
    %c0_192 = arith.constant 0 : index
    %c0_193 = arith.constant 0 : index
    %517 = vector.load %arg5[%c0_192, %c0_193] : memref<1x8xf32, #tpu.memory_space<vmem>>, vector<1x8xf32>
    tpu.vector_store %arg5[%c0_192, %c0_193], %516 {strides = array<i32>} : memref<1x8xf32, #tpu.memory_space<vmem>>, vector<1x8xf32>,
    return
  }
}

</mosaic_0001>

<bundles_post_ra>
// kernel: forward.1
= control target key start
LH: loop header
LB: loop body
LE: loop exit
PB: predicated region body
PF: predicated region fallthrough
CT: control target
= control target key end

     0   :  { %10 = vsyncpa [#allocation5], 0  ;;  %s3471_s0 = inlined_call_operand.vmem [shape: s32[16], index: 0, kind: input, shape index: {}]   ;;  %s3472_s1 = inlined_call_operand.hbm [shape: bf16[496,128], index: 1, kind: input, shape index: {}]   ;;  %s3473_s2 = inlined_call_operand.hbm [shape: f32[32,128], index: 2, kind: input, shape index: {}]   ;;  %s3474_s3 = inlined_call_operand.hbm [shape: bf16[480,128], index: 3, kind: input, shape index: {}]   ;;  %s3475_s4 = inlined_call_operand.hbm [shape: f32[32,128], index: 4, kind: input, shape index: {}]   ;;  %s3476_s5 = inlined_call_operand.hbm [shape: f32[1,8], index: 5, kind: output, shape index: {}]  }
   0x1   :  { %11 = vsyncpa [#allocation3], 0 }
   0x2   :  { %12 = vsyncpa [#allocation8], 0 }
   0x3   :  { %13 = vsyncpa [#allocation11], 0 }
   0x4   :  { %14 = vsyncpa [#allocation4], 0  ;;  %s3071_s18 = smov [#allocation7]   ;;  %s21_s22 = sshll.u32 %s3471_s0, 4  ;;  %s22_s22 = int_to_ptr.vmem [resolvable:$true] %s21_s22 }
   0x5   :  { %s42_s19 = sshll.u32 %s3071_s18, 4  ;;  %s2939_s25 = scalar_lea.hbm %s3473_s2, 512  ;;  %s43_s19 = int_to_ptr.vmem [resolvable:$true] %s42_s19 }
   0x6   :  { %p2940_p0 = scmp.ne.s32.totalorder %s3473_s2, %s2939_s25  ;;  %p2943_p1 = scmp.lt.u32.totalorder %s2939_s25, %s3473_s2 }
   0x8   :  { %p2945_p2 = pnand %p2943_p1, %p2940_p0 }
   0xa   :  { %2948 = shalt.err (!%p2945_p2)
}
   0xb   :  { %s2949_s30 = scalar_lea.vmem %s43_s19, 512  ;;  %p2954_p4 = scmp.lt.s32.totalorder %s43_s19, %s43_s19 }
   0xc   :  { %p2950_p3 = scmp.ne.s32.totalorder %s43_s19, %s2949_s30  ;;  %p2955_p5 = scmp.lt.s32.totalorder %s2949_s30, %s2949_s30 }
   0xe   :  { %p2956_p6 = por %p2955_p5, %p2954_p4 }
  0x10   :  { %p2957_p7 = pnand %p2956_p6, %p2950_p3 }
  0x12   :  { %2960 = shalt.err (!%p2957_p7)
}
  0x13   :  { %s3072_s0 = smov 128   ;;  %s3073_s6 = smov 8  }
  0x14   :  { %48 = dma.hbm_to_vmem [thread:$0]  %s3473_s2, 512, %s43_s19, [#allocation8], %s3072_s0, %s3072_s0, %s3073_s6  }
  0x15   :  { %s2961_s9 = scalar_lea.vmem %s22_s22, 16  ;;  %p2966_p9 = scmp.lt.s32.totalorder %s22_s22, %s22_s22 }
  0x16   :  { %p2962_p8 = scmp.ne.s32.totalorder %s22_s22, %s2961_s9  ;;  %p2967_p10 = scmp.lt.s32.totalorder %s2961_s9, %s2961_s9 }
  0x18   :  { %p2968_p11 = por %p2967_p10, %p2966_p9 }
  0x1a   :  { %p2969_p12 = pnand %p2968_p11, %p2962_p8 }
  0x1c   :  { %2972 = shalt.err (!%p2969_p12)
}
  0x1d   :  { %s3074_s10 = smov [#allocation2]   ;;  %s3075_s11 = smov [#allocation6]  }
  0x1e   :  { %24 = dma.vmem_to_smem %s22_s22, 16, %s3074_s10, [#allocation5]  }
  0x1f   :  { %s30_s12 = sshll.u32 %s3075_s11, 4  ;;  %s2973_s15 = scalar_lea.hbm %s3472_s1, 3968  ;;  %s31_s12 = int_to_ptr.vmem [resolvable:$true] %s30_s12 }
  0x20   :  { %p2974_p13 = scmp.ne.s32.totalorder %s3472_s1, %s2973_s15  ;;  %p2977_p0 = scmp.lt.u32.totalorder %s2973_s15, %s3472_s1 }
  0x22   :  { %p2979_p1 = pnand %p2977_p0, %p2974_p13 }
  0x24   :  { %2982 = shalt.err (!%p2979_p1)
}
  0x25   :  { %s2983_s19 = scalar_lea.vmem %s31_s12, 3968  ;;  %p2988_p3 = scmp.lt.s32.totalorder %s31_s12, %s31_s12 }
  0x26   :  { %p2984_p2 = scmp.ne.s32.totalorder %s31_s12, %s2983_s19  ;;  %p2989_p4 = scmp.lt.s32.totalorder %s2983_s19, %s2983_s19 }
  0x28   :  { %p2990_p5 = por %p2989_p4, %p2988_p3 }
  0x2a   :  { %p2991_p6 = pnand %p2990_p5, %p2984_p2 }
  0x2c   :  { %2994 = shalt.err (!%p2991_p6)
}
  0x2d   :  { %s3076_s20 = smov 64   ;;  %s3077_s21 = smov 4  }
  0x2e   :  { %36 = dma.hbm_to_vmem [thread:$0]  %s3472_s1, 3968, %s31_s12, [#allocation3], %s3076_s20, %s3076_s20, %s3077_s21  }
  0x2f   :  { %s3078_s24 = smov [#allocation9]   ;;  %s3079_s26 = smov [#allocation10]  }
  0x30   :  { %s54_s25 = sshll.u32 %s3078_s24, 4  ;;  %s66_s27 = sshll.u32 %s3079_s26, 4  ;;  %s55_s25 = int_to_ptr.vmem [resolvable:$true] %s54_s25  ;;  %s67_s27 = int_to_ptr.vmem [resolvable:$true] %s66_s27 }
  0x31   :  { %s2995_s30 = scalar_lea.hbm %s3474_s3, 3840 }
  0x32   :  { %p2996_p7 = scmp.ne.s32.totalorder %s3474_s3, %s2995_s30  ;;  %p2999_p8 = scmp.lt.u32.totalorder %s2995_s30, %s3474_s3 }
  0x34   :  { %p3001_p9 = pnand %p2999_p8, %p2996_p7 }
  0x36   :  { %3004 = shalt.err (!%p3001_p9)
}
  0x37   :  { %s3005_s1 = scalar_lea.vmem %s55_s25, 3840  ;;  %p3010_p11 = scmp.lt.s32.totalorder %s55_s25, %s55_s25 }
  0x38   :  { %p3006_p10 = scmp.ne.s32.totalorder %s55_s25, %s3005_s1  ;;  %p3011_p12 = scmp.lt.s32.totalorder %s3005_s1, %s3005_s1 }
  0x3a   :  { %p3012_p13 = por %p3011_p12, %p3010_p11 }
  0x3c   :  { %p3013_p0 = pnand %p3012_p13, %p3006_p10 }
  0x3e   :  { %3016 = shalt.err (!%p3013_p0)
}
  0x3f   :  { %60 = dma.hbm_to_vmem [thread:$0]  %s3474_s3, 3840, %s55_s25, [#allocation8], %s3076_s20, %s3076_s20, %s3077_s21  }
  0x40   :  { %s3017_s15 = scalar_lea.hbm %s3475_s4, 512 }
  0x41   :  { %p3018_p1 = scmp.ne.s32.totalorder %s3475_s4, %s3017_s15  ;;  %p3021_p2 = scmp.lt.u32.totalorder %s3017_s15, %s3475_s4 }
  0x43   :  { %p3023_p3 = pnand %p3021_p2, %p3018_p1 }
  0x45   :  { %3026 = shalt.err (!%p3023_p3)
}
  0x46   :  { %s3027_s19 = scalar_lea.vmem %s67_s27, 512  ;;  %p3032_p5 = scmp.lt.s32.totalorder %s67_s27, %s67_s27 }
  0x47   :  { %p3028_p4 = scmp.ne.s32.totalorder %s67_s27, %s3027_s19  ;;  %p3033_p6 = scmp.lt.s32.totalorder %s3027_s19, %s3027_s19 }
  0x49   :  { %p3034_p7 = por %p3033_p6, %p3032_p5 }
  0x4b   :  { %p3035_p8 = pnand %p3034_p7, %p3028_p4 }
  0x4d   :  { %3038 = shalt.err (!%p3035_p8)
}
  0x4e   :  { %72 = dma.hbm_to_vmem [thread:$0]  %s3475_s4, 512, %s67_s27, [#allocation11], %s3072_s0, %s3072_s0, %s3073_s6  }
  0x4f   :  { %3061 = dma.done.wait [#allocation5], 16  }
  0x50   :  { %3062 = vsyncadd [#allocation5], 4294967280 }
  0x51   :  { %3063 = dma.done.wait [#allocation3], 3968  }
  0x52   :  { %3064 = vsyncadd [#allocation3], 4294963328 }
  0x53   :  { %3065 = dma.done.wait [#allocation8], 4352  }
  0x54   :  { %3066 = vsyncadd [#allocation8], 4294962944 }
  0x55   :  { %3067 = dma.done.wait [#allocation11], 512  }
  0x56   :  { %3068 = vsyncadd [#allocation11], 4294966784 }
  0x57   :  { %88 = sfence }
  0x58   :  { %v2843_v0 = vld [vmem:[#allocation6] sm:$0xff]   ;;  %v90_v1 = vlaneseq  ;;  %v3080_v2 = vmov 0.0   ;;  %s95_s22 = sld [smem:[#allocation2]]  ;;  %s2341_s23 = sld [smem:[#allocation2 + $0x1]]  ;;  %vm3081_vm0 = vmmov 0   ;;  %vm139_vm9 = vcmask 130048  }
  0x59   :  { %2574 = vmatprep.subr.bf16.mxu0 %v3080_v2  ;;  %2580 = vmatprep.subr.bf16.mxu1 %v3080_v2  ;;  %s2342_s4 = sld [smem:[#allocation2 + $0x2]]  ;;  %s2343_s0 = sld [smem:[#allocation2 + $0x3]]  ;;  %v2844_v22 = vld [vmem:[#allocation6 + $0x8] sm:$0xff]   ;;  %v2845_v24 = vld [vmem:[#allocation6 + $0x10] sm:$0xff]   ;;  %v132_v25 = vld [vmem:[#allocation7] sm:$0xff]  ;;  %vm285_vm11 = vcmask 261120  }
  0x5a   :  { %2575 = vmatpush3.bf16.msra.mxu0 %v2843_v0  ;;  %2576 = vmatprep.mubr.msk.bf16.mxu0 %vm3081_vm0, %v3080_v2  ;;  %v3179_v3 = vshrl.u32 %v90_v1, 7  ;;  %s2344_s6 = sld [smem:[#allocation2 + $0x4]]  ;;  %s2345_s24 = sld [smem:[#allocation2 + $0x5]]  ;;  %v3184_v4 = vand.u32 127, %v90_v1  ;;  %v2846_v32 = vld [vmem:[#allocation9] sm:$0xff]   ;;  %vm380_vm13 = vcmask 64512  }
  0x5b   :  { %2586 = vmatprep.subr.bf16.mxu0 %v3080_v2  ;;  %2582 = vmatprep.mubr.msk.bf16.mxu1 %vm3081_vm0, %v3080_v2  ;;  %s2346_s25 = sld [smem:[#allocation2 + $0x6]]  ;;  %s2347_s26 = sld [smem:[#allocation2 + $0x7]]  ;;  %v2362_v51 = vld [vmem:[#allocation7 + $0x8] ss:$0 sm:$0xff]  ;;  %vm398_vm14 = vcmask 1043456   ;;  %vm2258_vm15 = vcmask 253952  }
  0x5c   :  { %vm94_vm1 = vcmp.eq.s32.totalorder %v3179_v3, 0  ;;  %vm98_vm2 = vcmp.eq.s32.totalorder %v3179_v3, 1  ;;  %vm102_vm3 = vcmp.eq.s32.totalorder %v3179_v3, 2  ;;  %vm106_vm4 = vcmp.eq.s32.totalorder %v3179_v3, 3  ;;  %s2351_s27 = sld [smem:[#allocation2 + $0x8]]  ;;  %s2352_s28 = sld [smem:[#allocation2 + $0x9]]  ;;  %2581 = vmatpush3.bf16.msra.mxu1 %v2846_v32 }
  0x5d   :  { %vm110_vm5 = vcmp.eq.s32.totalorder %v3179_v3, 4  ;;  %vm114_vm6 = vcmp.eq.s32.totalorder %v3179_v3, 5  ;;  %vm118_vm7 = vcmp.eq.s32.totalorder %v3179_v3, 6  ;;  %vm122_vm8 = vcmp.eq.s32.totalorder %v3179_v3, 7  ;;  %s2353_s29 = sld [smem:[#allocation2 + $0xa]]  ;;  %s2354_s30 = sld [smem:[#allocation2 + $0xb]]  ;;  %2594 = vmatprep.subr.bf16.mxu1 %v3080_v2 }
  0x5e   :  { %v96_v5 = vstv %s95_s22  ;;  %v100_v6 = vstv %s2341_s23  ;;  %s2355_s7 = sld [smem:[#allocation2 + $0xc]]  ;;  %s2356_s8 = sld [smem:[#allocation2 + $0xd]] }
  0x5f   :  { %v97_v7 = vsel %vm94_vm1, %v96_v5, 0  ;;  %v104_v8 = vstv %s2342_s4  ;;  %v108_v9 = vstv %s2343_s0  ;;  %s2357_s9 = sld [smem:[#allocation2 + $0xe]]  ;;  %s2358_s10 = sld [smem:[#allocation2 + $0xf]] }
  0x60   :  { %v101_v10 = vsel %vm98_vm2, %v100_v6, %v97_v7  ;;  %v112_v11 = vstv %s2344_s6  ;;  %v116_v13 = vstv %s2345_s24  ;;  %s3082_s1 = smov 96  }
  0x61   :  { %v105_v12 = vsel %vm102_vm3, %v104_v8, %v101_v10  ;;  %v120_v15 = vstv %s2346_s25  ;;  %v124_v17 = vstv %s2347_s26 }
  0x62   :  { %v109_v14 = vsel %vm106_vm4, %v108_v9, %v105_v12  ;;  %v184_v33 = vstv %s2351_s27  ;;  %v187_v34 = vstv %s2352_s28  ;;  %v2847_v12 = vld [vmem:[#allocation6 + $0x18] sm:$0xff]  }
  0x63   :  { %v113_v16 = vsel %vm110_vm5, %v112_v11, %v109_v14  ;;  %v185_v35 = vsel %vm94_vm1, %v184_v33, 0  ;;  %v190_v36 = vstv %s2353_s29  ;;  %v193_v37 = vstv %s2354_s30 }
  0x64   :  { %v117_v18 = vsel %vm114_vm6, %v116_v13, %v113_v16  ;;  %v188_v38 = vsel %vm98_vm2, %v187_v34, %v185_v35  ;;  %v196_v39 = vstv %s2355_s7  ;;  %v199_v41 = vstv %s2356_s8 }
  0x65   :  { %v121_v19 = vsel %vm118_vm7, %v120_v15, %v117_v18  ;;  %v191_v40 = vsel %vm102_vm3, %v190_v36, %v188_v38  ;;  %v202_v43 = vstv %s2357_s9  ;;  %v205_v45 = vstv %s2358_s10 }
  0x66   :  { %v125_v20 = vsel %vm122_vm8, %v124_v17, %v121_v19  ;;  %v194_v42 = vsel %vm106_vm4, %v193_v37, %v191_v40  ;;  %v2848_v19 = vld [vmem:[#allocation6 + $0x20] sm:$0xff]   ;;  %v2850_v40 = vld [vmem:[#allocation6 + $0x30] sm:$0xff]   ;;  %vm2310_vm1 = vcmask 57344  }
  0x67   :  { %vm126_vm10 = vcmp.eq.s32.totalorder %v3184_v4, %v125_v20  ;;  %v197_v44 = vsel %vm110_vm5, %v196_v39, %v194_v42  ;;  %v2849_v39 = vld [vmem:[#allocation6 + $0x28] sm:$0xff]  }
  0x68   :  { %v2348_v21 = vsel %vm126_vm10, 1.0, %v3080_v2  ;;  %v200_v46 = vsel %vm114_vm6, %v199_v41, %v197_v44  ;;  %v2853_v41 = vld [vmem:[#allocation6 + $0x38] sm:$0xff]   ;;  %v2855_v42 = vld [vmem:[#allocation6 + $0x48] sm:$0xff]  }
  0x69   :  { %v129_v23 = vpack.c.bf16 %v2348_v21, %v2348_v21  ;;  %v203_v47 = vsel %vm118_vm7, %v202_v43, %v200_v46  ;;  %v2856_v43 = vld [vmem:[#allocation6 + $0x50] sm:$0xff]   ;;  %v2857_v44 = vld [vmem:[#allocation6 + $0x58] sm:$0xff]  }
  0x6a   :  { %v206_v48 = vsel %vm122_vm8, %v205_v45, %v203_v47  ;;  %v2858_v45 = vld [vmem:[#allocation6 + $0x60] sm:$0xff]  }
  0x6b   :  { %2577 = vmatmul.mubr.msk.bf16.vlgmr.msra.gmra.mrb[0].mxu0 %vm139_vm9, %v129_v23  ;;  %vm207_vm12 = vcmp.eq.s32.totalorder %v3184_v4, %v206_v48 }
  0x6c   :  { %2587 = vmatpush3.bf16.msra.mxu0 %v2844_v22  ;;  %2590 = vmatprep.mubr.msk.bf16.mxu0 %vm3081_vm0, %v3080_v2  ;;  %v2359_v49 = vsel %vm207_vm12, 1.0, %v3080_v2 }
  0x6d   :  { %2588 = vmatprep.subr.bf16.mxu0 %v3080_v2  ;;  %v210_v50 = vpack.c.bf16 %v2359_v49, %v2359_v49 }
  0x6f   :  { %2583 = vmatmul.mubr.msk.bf16.vlgmr.msra.gmra.mrb[0].mxu1 %vm139_vm9, %v210_v50  ;;  %v2372_v50 = vld [vmem:[#allocation7 + $0xa] ss:$0 sm:$0xff] }
  0x70   :  { %2589 = vmatpush3.bf16.msra.mxu0 %v2845_v24  ;;  %2596 = vmatprep.mubr.msk.bf16.mxu1 %vm3081_vm0, %v3080_v2 }
  0x71   :  { %2600 = vmatprep.subr.bf16.mxu0 %v3080_v2 }
 0x13e   :  { %v177_v26 = vpop.f32.mrb[0].mxu0 }
 0x13f   :  { %v3217_v27 = vadd.f32 %v177_v26, %v132_v25  ;;  %v2578_v28 = vpop.f32.mrb[1].mxu0  ;;  %v2368_v25 = vld [vmem:[#allocation7 + $0x9] ss:$0 sm:$0xff] }
 0x140   :  { %v180_v29 = vpop.f32.mrb[2].mxu0 }
 0x141   :  { %v267_v30 = vpack.c.bf16 %v3217_v27, %v3217_v27  ;;  %v2579_v31 = vpop.f32.mrb[3].mxu0 }
 0x142   :  { %v3247_v58 = vpop.f32.mrb[0].mxu1 }
 0x143   :  { %2591 = vmatmul.mubr.msk.bf16.vlgmr.msra.gmra.mrb[4].mxu0 %vm285_vm11, %v267_v30  ;;  %v2584_v59 = vpop.f32.mrb[1].mxu1 }
 0x144   :  { %2602 = vmatprep.mubr.msk.bf16.mxu0 %vm3081_vm0, %v3080_v2  ;;  %v260_v60 = vpop.f32.mrb[2].mxu1  ;;  %v2852_v59 = vld [vmem:[#allocation9 + $0x10] sm:$0xff]  }
 0x145   :  { %v2585_v61 = vpop.f32.mrb[3].mxu1 }
 0x216   :  { %v323_v52 = vpop.f32.mrb[4].mxu0 }
 0x217   :  { %v324_v53 = vadd.f32 %v2362_v51, %v323_v52  ;;  %v2592_v54 = vpop.f32.mrb[5].mxu0  ;;  %v2373_v52 = vld [vmem:[#allocation7 + $0xb] ss:$0 sm:$0xff] }
 0x218   :  { %v326_v55 = vpop.f32.mrb[6].mxu0 }
 0x219   :  { %v329_v56 = vpack.c.bf16 %v324_v53, %v324_v53  ;;  %v2593_v57 = vpop.f32.mrb[7].mxu0  ;;  %v2851_v55 = vld [vmem:[#allocation9 + $0x8] sm:$0xff]  }
 0x21a   :  { %v213_v57 = vld [vmem:[#allocation10] sm:$0xff] }
 0x21b   :  { %331 = vrot.lane.b32.xlu0 %v329_v56, %s3082_s1  ;;  %v3286_v60 = vadd.f32 %v3247_v58, %v213_v57  ;;  %v2374_v58 = vld [vmem:[#allocation7 + $0xc] ss:$0 sm:$0xff] }
 0x21d   :  { %v740_v61 = vpack.c.bf16 %v3286_v60, %v3286_v60 }
 0x28d   :  { %v332_v62 = vpop.permute.xlu0 %331 }
 0x28e   :  { %v337_v63 = vsel %vm285_vm11, %v332_v62, 0  ;;  %v2859_v62 = vld [vmem:[#allocation6 + $0x68] sm:$0xff]  }
 0x28f   :  { %2595 = vmatpush3.bf16.xpose.msra.mxu1 %v337_v63  ;;  %v2860_v63 = vld [vmem:[#allocation6 + $0x70] sm:$0xff]  }
 0x290   :  { %2606 = vmatprep.subr.bf16.mxu1 %v3080_v2 }
 0x296   :  { %2597 = vmatmul.mubr.msk.bf16.vlgmr.msra.gmra.mrb[4].mxu1 %vm285_vm11, %v329_v56 }
 0x297   :  { %2610 = vmatprep.mubr.msk.bf16.mxu1 %vm3081_vm0, %v3080_v2  ;;  %2607 = vmatpush3.bf16.msra.mxu1 %v2847_v12 }
 0x298   :  { %2608 = vmatprep.subr.bf16.mxu1 %v3080_v2 }
 0x29b   :  { %2609 = vmatpush3.bf16.msra.mxu1 %v2848_v19 }
 0x29c   :  { %2622 = vmatprep.subr.bf16.mxu1 %v3080_v2 }
 0x369   :  { %v373_v0 = vpop.f32.mrb[4].mxu1 }
 0x36a   :  { %v379_v1 = vmul.f32 0.17677669, %v373_v0  ;;  %v2598_v3 = vpop.f32.mrb[5].mxu1 }
 0x36b   :  { %v376_v4 = vpop.f32.mrb[6].mxu1 }
 0x36c   :  { %v2599_v5 = vpop.f32.mrb[7].mxu1  ;;  %v381_v6 = vsel %vm380_vm13, %v379_v1, -inf }
 0x36d   :  { %382 = vmax.xlane.f32.xlu0 %v381_v6 }
 0x3fa   :  { %v383_v7 = vpop.xlane.xlu0 %382 }
 0x3fb   :  { %v384_v8 = vsub.f32 %v379_v1, %v383_v7 }
 0x3fd   :  { %v385_v9 = vmul.f32 1.442695, %v384_v8  ;;  %v2389_v8 = vld [vmem:[#allocation10 + $0x8] ss:$0 sm:$0xff] }
 0x3ff   :  { %2903 = vpow2.f32 %v385_v9 }
 0x409   :  { %v2904_v10 = vpop.eup %2903 }
 0x40a   :  { %v387_v11 = vsel %vm380_vm13, %v2904_v10, 0.0 }
 0x40b   :  { %388 = vadd.xlane.f32.xlu1 %v387_v11 }
 0x41c   :  { %393 = vrot.lane.b32.xlu1 %v329_v56, %s3076_s20 }
 0x498   :  { %v389_v13 = vpop.xlane.xlu1 %388 }
 0x499   :  { %2905 = vrcp.f32 %v389_v13 }
 0x49c   :  { %v394_v14 = vpop.permute.xlu1 %393 }
 0x49d   :  { %v400_v15 = vsel %vm398_vm14, %v394_v14, 0 }
 0x49e   :  { %2601 = vmatpush3.bf16.msra.mxu0 %v400_v15 }
 0x49f   :  { %2614 = vmatprep.subr.bf16.mxu0 %v3080_v2 }
 0x4a3   :  { %v2906_v16 = vpop.eup %2905 }
 0x4a4   :  { %v391_v17 = vmul.f32 %v2906_v16, %v2904_v10 }
 0x4a6   :  { %v392_v18 = vpack.c.bf16 %v391_v17, %v391_v17 }
 0x4a8   :  { %2603 = vmatmul.mubr.msk.bf16.vlgmr.msra.gmra.mrb[8].mxu0 %vm380_vm13, %v392_v18 }
 0x4a9   :  { %2618 = vmatprep.mubr.msk.bf16.mxu0 %vm3081_vm0, %v3080_v2  ;;  %2615 = vmatpush3.bf16.msra.mxu0 %v2849_v39 }
 0x4aa   :  { %2616 = vmatprep.subr.bf16.mxu0 %v3080_v2 }
 0x4ad   :  { %2617 = vmatpush3.bf16.msra.mxu0 %v2850_v40 }
 0x4ae   :  { %2642 = vmatprep.subr.bf16.mxu0 %v3080_v2 }
 0x57b   :  { %v436_v20 = vpop.f32.mrb[8].mxu0 }
 0x57c   :  { %v446_v21 = vpack.c.bf16 %v436_v20, %v436_v20  ;;  %v2604_v22 = vpop.f32.mrb[9].mxu0 }
 0x57d   :  { %v439_v23 = vpop.f32.mrb[10].mxu0 }
 0x57e   :  { %v2605_v24 = vpop.f32.mrb[11].mxu0  ;;  %2611 = vmatmul.mubr.msk.bf16.vlgmr.msra.gmra.mrb[8].mxu1 %vm285_vm11, %v446_v21 }
 0x57f   :  { %2638 = vmatprep.mubr.msk.bf16.mxu1 %vm3081_vm0, %v3080_v2  ;;  %2623 = vmatpush3.bf16.msra.mxu1 %v2853_v41 }
 0x580   :  { %2624 = vmatprep.subr.bf16.mxu1 %v3080_v2 }
 0x651   :  { %v501_v26 = vpop.f32.mrb[8].mxu1 }
 0x652   :  { %v502_v28 = vadd.f32 %v2368_v25, %v501_v26  ;;  %v2612_v29 = vpop.f32.mrb[9].mxu1 }
 0x653   :  { %v504_v30 = vpop.f32.mrb[10].mxu1 }
 0x654   :  { %v2613_v31 = vpop.f32.mrb[11].mxu1  ;;  %v507_v32 = vadd.f32 %v502_v28, %v3217_v27  ;;  %v2854_v27 = vld [vmem:[#allocation6 + $0x40] sm:$0xff]  }
 0x655   :  { %2625 = vmatpush3.bf16.msra.mxu1 %v2854_v27  ;;  %v2861_v27 = vld [vmem:[#allocation9 + $0x18] sm:$0xff]  }
 0x656   :  { %v510_v33 = vsel %vm285_vm11, %v507_v32, 0.0  ;;  %2626 = vmatprep.subr.bf16.mxu1 %v3080_v2 }
 0x657   :  { %511 = vadd.xlane.f32.xlu1 %v510_v33  ;;  %v2378_v33 = vld [vmem:[#allocation7 + $0xd] ss:$0 sm:$0xff] }
 0x659   :  { %2627 = vmatpush3.bf16.msra.mxu1 %v2855_v42 }
 0x65a   :  { %2628 = vmatprep.subr.bf16.mxu1 %v3080_v2 }
 0x65d   :  { %2629 = vmatpush3.bf16.msra.mxu1 %v2856_v43  ;;  %v2862_v43 = vld [vmem:[#allocation9 + $0x20] sm:$0xff]  }
 0x65e   :  { %2630 = vmatprep.subr.bf16.mxu1 %v3080_v2 }
 0x661   :  { %2631 = vmatpush3.bf16.msra.mxu1 %v2857_v44 }
 0x662   :  { %2632 = vmatprep.subr.bf16.mxu1 %v3080_v2 }
 0x665   :  { %2633 = vmatpush3.bf16.msra.mxu1 %v2858_v45 }
 0x666   :  { %2634 = vmatprep.subr.bf16.mxu1 %v3080_v2 }
 0x669   :  { %2635 = vmatpush3.bf16.msra.mxu1 %v2859_v62 }
 0x66a   :  { %2636 = vmatprep.subr.bf16.mxu1 %v3080_v2 }
 0x66d   :  { %2637 = vmatpush3.bf16.msra.mxu1 %v2860_v63 }
 0x66e   :  { %2670 = vmatprep.subr.bf16.mxu1 %v3080_v2 }
 0x6e4   :  { %v512_v34 = vpop.xlane.xlu1 %511 }
 0x6e5   :  { %v514_v35 = vmul.f32 0.03125, %v512_v34 }
 0x6e7   :  { %v515_v36 = vsub.f32 %v507_v32, %v514_v35 }
 0x6e9   :  { %v516_v37 = vmul.f32 %v515_v36, %v515_v36 }
 0x6eb   :  { %v517_v38 = vsel %vm285_vm11, %v516_v37, 0.0 }
 0x6ec   :  { %518 = vadd.xlane.f32.xlu0 %v517_v38 }
 0x779   :  { %v519_v46 = vpop.xlane.xlu0 %518 }
 0x77a   :  { %v520_v47 = vmul.f32 0.03125, %v519_v46 }
 0x77c   :  { %v521_v48 = vadd.f32 1e-05, %v520_v47 }
 0x77e   :  { %2907 = vrsqrt.f32 %v521_v48 }
 0x788   :  { %v2908_v49 = vpop.eup %2907 }
 0x789   :  { %v523_v51 = vmul.f32 %v2908_v49, %v515_v36  ;;  %v2395_v49 = vld [vmem:[#allocation10 + $0x9] ss:$0 sm:$0xff] }
 0x78b   :  { %v528_v53 = vmul.f32 %v2372_v50, %v523_v51 }
 0x78d   :  { %v3278_v54 = vadd.f32 %v2373_v52, %v528_v53 }
 0x78f   :  { %v538_v56 = vpack.c.bf16 %v3278_v54, %v3278_v54 }
 0x791   :  { %2619 = vmatmul.mubr.msk.bf16.vlgmr.msra.gmra.mrb[12].mxu0 %vm285_vm11, %v538_v56 }
 0x792   :  { %2643 = vmatpush3.bf16.msra.mxu0 %v2851_v55  ;;  %2646 = vmatprep.mubr.msk.bf16.mxu0 %vm3081_vm0, %v3080_v2 }
 0x793   :  { %2644 = vmatprep.subr.bf16.mxu0 %v3080_v2 }
 0x796   :  { %2645 = vmatpush3.bf16.msra.mxu0 %v2852_v59 }
 0x797   :  { %2650 = vmatprep.subr.bf16.mxu0 %v3080_v2 }
 0x799   :  { %2647 = vmatmul.mubr.msk.bf16.vlgmr.msra.gmra.mrb[16].mxu0 %vm285_vm11, %v740_v61 }
 0x79a   :  { %2652 = vmatprep.mubr.msk.bf16.mxu0 %vm3081_vm0, %v3080_v2 }
 0x864   :  { %v593_v0 = vpop.f32.mrb[12].mxu0 }
 0x865   :  { %v594_v1 = vadd.f32 %v2374_v58, %v593_v0  ;;  %v2620_v3 = vpop.f32.mrb[13].mxu0 }
 0x866   :  { %v596_v4 = vpop.f32.mrb[14].mxu0 }
 0x867   :  { %v599_v5 = vmax.f32 %v594_v1, 0.0  ;;  %v2621_v6 = vpop.f32.mrb[15].mxu0 }
 0x868   :  { %v2867_v6 = vld [vmem:[#allocation9 + $0x38] sm:$0xff]  }
 0x869   :  { %v616_v7 = vpack.c.bf16 %v599_v5, %v599_v5  ;;  %v2863_v5 = vld [vmem:[#allocation9 + $0x28] sm:$0xff]  }
 0x86b   :  { %2639 = vmatmul.mubr.bf16.vlgmr.msra.gmra.mrb[12].mxu1 %v616_v7  ;;  %v2868_v7 = vld [vmem:[#allocation9 + $0x40] sm:$0xff]  }
 0x86c   :  { %v795_v9 = vpop.f32.mrb[16].mxu0  ;;  %2674 = vmatprep.mubr.msk.bf16.mxu1 %vm3081_vm0, %v3080_v2  ;;  %2671 = vmatpush3.bf16.msra.mxu1 %v2863_v5 }
 0x86d   :  { %v796_v10 = vadd.f32 %v2389_v8, %v795_v9  ;;  %v2648_v11 = vpop.f32.mrb[17].mxu0  ;;  %2672 = vmatprep.subr.bf16.mxu1 %v3080_v2  ;;  %v2869_v8 = vld [vmem:[#allocation9 + $0x48] sm:$0xff]   ;;  %v2870_v9 = vld [vmem:[#allocation9 + $0x50] sm:$0xff]  }
 0x86e   :  { %v798_v12 = vpop.f32.mrb[18].mxu0  ;;  %v2872_v11 = vld [vmem:[#allocation9 + $0x60] sm:$0xff]  }
 0x86f   :  { %v801_v13 = vpack.c.bf16 %v796_v10, %v796_v10  ;;  %v2649_v14 = vpop.f32.mrb[19].mxu0  ;;  %v2871_v10 = vld [vmem:[#allocation9 + $0x58] sm:$0xff]  }
 0x871   :  { %803 = vrot.lane.b32.xlu0 %v801_v13, %s3082_s1 }
 0x8e3   :  { %v804_v15 = vpop.permute.xlu0 %803 }
 0x8e4   :  { %v809_v16 = vsel %vm285_vm11, %v804_v15, 0 }
 0x8e5   :  { %2651 = vmatpush3.bf16.xpose.msra.mxu0 %v809_v16 }
 0x8e6   :  { %2656 = vmatprep.subr.bf16.mxu0 %v3080_v2 }
 0x8ec   :  { %2653 = vmatmul.mubr.msk.bf16.vlgmr.msra.gmra.mrb[20].mxu0 %vm285_vm11, %v801_v13 }
 0x8ed   :  { %2658 = vmatprep.mubr.msk.bf16.mxu0 %vm3081_vm0, %v3080_v2 }
 0x93e   :  { %v704_v17 = vpop.f32.mrb[12].mxu1 }
 0x93f   :  { %v2640_v18 = vpop.f32.mrb[13].mxu1  ;;  %v705_v34 = vadd.f32 %v2378_v33, %v704_v17 }
 0x940   :  { %v707_v19 = vpop.f32.mrb[14].mxu1 }
 0x941   :  { %v2641_v20 = vpop.f32.mrb[15].mxu1  ;;  %v710_v37 = vadd.f32 %v705_v34, %v3278_v54  ;;  %v2399_v19 = vld [vmem:[#allocation10 + $0xa] ss:$0 sm:$0xff] }
 0x943   :  { %v713_v38 = vsel %vm285_vm11, %v710_v37, 0.0 }
 0x9bf   :  { %v845_v21 = vpop.f32.mrb[20].mxu0 }
 0x9c0   :  { %v851_v22 = vmul.f32 0.17677669, %v845_v21  ;;  %v2654_v23 = vpop.f32.mrb[21].mxu0  ;;  %v2400_v21 = vld [vmem:[#allocation10 + $0xb] ss:$0 sm:$0xff] }
 0x9c1   :  { %v848_v24 = vpop.f32.mrb[22].mxu0 }
 0x9c2   :  { %v2655_v25 = vpop.f32.mrb[23].mxu0  ;;  %v852_v26 = vsel %vm380_vm13, %v851_v22, -inf  ;;  %v2387_v24 = vld [vmem:[#allocation7 + $0xe] ss:$0 sm:$0xff] }
 0x9c3   :  { %853 = vmax.xlane.f32.xlu1 %v852_v26 }
 0x9d4   :  { %864 = vrot.lane.b32.xlu1 %v801_v13, %s3076_s20 }
 0xa50   :  { %v854_v28 = vpop.xlane.xlu1 %853 }
 0xa51   :  { %v855_v29 = vsub.f32 %v851_v22, %v854_v28  ;;  %v2865_v28 = vld [vmem:[#allocation6 + $0x78] sm:$0xff]  }
 0xa53   :  { %v856_v30 = vmul.f32 1.442695, %v855_v29 }
 0xa54   :  { %v865_v31 = vpop.permute.xlu1 %864 }
 0xa55   :  { %2909 = vpow2.f32 %v856_v30  ;;  %v870_v32 = vsel %vm398_vm14, %v865_v31, 0  ;;  %v2388_v31 = vld [vmem:[#allocation7 + $0xf] ss:$0 sm:$0xff] }
 0xa56   :  { %2657 = vmatpush3.bf16.msra.mxu0 %v870_v32  ;;  %v2866_v32 = vld [vmem:[#allocation6 + $0x80] sm:$0xff]  }
 0xa57   :  { %2662 = vmatprep.subr.bf16.mxu0 %v3080_v2 }
 0xa5f   :  { %v2910_v35 = vpop.eup %2909 }
 0xa60   :  { %v858_v36 = vsel %vm380_vm13, %v2910_v35, 0.0 }
 0xa61   :  { %859 = vadd.xlane.f32.xlu0 %v858_v36  ;;  %v2874_v36 = vld [vmem:[#allocation9 + $0x70] sm:$0xff]  }
 0xa65   :  { %714 = vadd.xlane.f32.xlu0 %v713_v38 }
 0xaee   :  { %v860_v39 = vpop.xlane.xlu0 %859 }
 0xaef   :  { %2911 = vrcp.f32 %v860_v39 }
 0xaf2   :  { %v715_v57 = vpop.xlane.xlu0 %714 }
 0xaf3   :  { %v716_v59 = vmul.f32 0.03125, %v715_v57 }
 0xaf5   :  { %v717_v63 = vsub.f32 %v710_v37, %v716_v59  ;;  %v2401_v37 = vld [vmem:[#allocation10 + $0xc] ss:$0 sm:$0xff] }
 0xaf7   :  { %v718_v3 = vmul.f32 %v717_v63, %v717_v63 }
 0xaf9   :  { %v2912_v40 = vpop.eup %2911  ;;  %v719_v4 = vsel %vm285_vm11, %v718_v3, 0.0 }
 0xafa   :  { %v862_v41 = vmul.f32 %v2912_v40, %v2910_v35  ;;  %v2873_v35 = vld [vmem:[#allocation9 + $0x68] sm:$0xff]  }
 0xafc   :  { %v863_v42 = vpack.c.bf16 %v862_v41, %v862_v41 }
 0xafe   :  { %2659 = vmatmul.mubr.msk.bf16.vlgmr.msra.gmra.mrb[24].mxu0 %vm380_vm13, %v863_v42 }
 0xaff   :  { %2663 = vmatpush3.bf16.msra.mxu0 %v2861_v27  ;;  %2666 = vmatprep.mubr.msk.bf16.mxu0 %vm3081_vm0, %v3080_v2 }
 0xb00   :  { %2664 = vmatprep.subr.bf16.mxu0 %v3080_v2 }
 0xb03   :  { %2665 = vmatpush3.bf16.msra.mxu0 %v2862_v43 }
 0xb04   :  { %2678 = vmatprep.subr.bf16.mxu0 %v3080_v2 }
 0xbd1   :  { %v906_v44 = vpop.f32.mrb[24].mxu0 }
 0xbd2   :  { %v916_v45 = vpack.c.bf16 %v906_v44, %v906_v44  ;;  %v2660_v46 = vpop.f32.mrb[25].mxu0  ;;  %v2416_v44 = vld [vmem:[#allocation7 + $0x10] ss:$0 sm:$0xff] }
 0xbd3   :  { %v909_v47 = vpop.f32.mrb[26].mxu0 }
 0xbd4   :  { %v2661_v48 = vpop.f32.mrb[27].mxu0  ;;  %2667 = vmatmul.mubr.msk.bf16.vlgmr.msra.gmra.mrb[28].mxu0 %vm285_vm11, %v916_v45 }
 0xbd5   :  { %2694 = vmatprep.mubr.msk.bf16.mxu0 %vm3081_vm0, %v3080_v2  ;;  %2679 = vmatpush3.bf16.msra.mxu0 %v2867_v6 }
 0xbd6   :  { %2680 = vmatprep.subr.bf16.mxu0 %v3080_v2 }
 0xbd9   :  { %2681 = vmatpush3.bf16.msra.mxu0 %v2868_v7 }
 0xbda   :  { %2682 = vmatprep.subr.bf16.mxu0 %v3080_v2 }
 0xbdd   :  { %2683 = vmatpush3.bf16.msra.mxu0 %v2869_v8 }
 0xbde   :  { %2684 = vmatprep.subr.bf16.mxu0 %v3080_v2 }
 0xbe1   :  { %2685 = vmatpush3.bf16.msra.mxu0 %v2870_v9 }
 0xbe2   :  { %2686 = vmatprep.subr.bf16.mxu0 %v3080_v2 }
 0xbe5   :  { %2687 = vmatpush3.bf16.msra.mxu0 %v2871_v10 }
 0xbe6   :  { %2688 = vmatprep.subr.bf16.mxu0 %v3080_v2 }
 0xbe9   :  { %2689 = vmatpush3.bf16.msra.mxu0 %v2872_v11 }
 0xbea   :  { %2690 = vmatprep.subr.bf16.mxu0 %v3080_v2 }
 0xbed   :  { %2691 = vmatpush3.bf16.msra.mxu0 %v2873_v35 }
 0xbee   :  { %2692 = vmatprep.subr.bf16.mxu0 %v3080_v2 }
 0xbf1   :  { %2693 = vmatpush3.bf16.msra.mxu0 %v2874_v36 }
 0xbf2   :  { %2726 = vmatprep.subr.bf16.mxu0 %v3080_v2 }
 0xca7   :  { %v971_v50 = vpop.f32.mrb[28].mxu0 }
 0xca8   :  { %v972_v51 = vadd.f32 %v2395_v49, %v971_v50  ;;  %v2668_v52 = vpop.f32.mrb[29].mxu0 }
 0xca9   :  { %v974_v53 = vpop.f32.mrb[30].mxu0 }
 0xcaa   :  { %v2669_v54 = vpop.f32.mrb[31].mxu0  ;;  %v977_v55 = vadd.f32 %v972_v51, %v3286_v60  ;;  %v2864_v60 = vld [vmem:[#allocation9 + $0x30] sm:$0xff]  }
 0xcab   :  { %2673 = vmatpush3.bf16.msra.mxu1 %v2864_v60  ;;  %v2405_v60 = vld [vmem:[#allocation10 + $0xd] ss:$0 sm:$0xff] }
 0xcac   :  { %v980_v56 = vsel %vm285_vm11, %v977_v55, 0.0  ;;  %2698 = vmatprep.subr.bf16.mxu1 %v3080_v2 }
 0xcad   :  { %981 = vadd.xlane.f32.xlu1 %v980_v56 }
 0xd3a   :  { %v982_v61 = vpop.xlane.xlu1 %981 }
 0xd3b   :  { %v983_v62 = vmul.f32 0.03125, %v982_v61 }
 0xd3d   :  { %v984_v58 = vsub.f32 %v977_v55, %v983_v62 }
 0xd3f   :  { %v985_v0 = vmul.f32 %v984_v58, %v984_v58 }
 0xd41   :  { %v986_v1 = vsel %vm285_vm11, %v985_v0, 0.0 }
 0xd42   :  { %987 = vadd.xlane.f32.xlu0 %v986_v1 }
 0xd46   :  { %720 = vadd.xlane.f32.xlu0 %v719_v4 }
 0xdcf   :  { %v988_v12 = vpop.xlane.xlu0 %987 }
 0xdd0   :  { %v989_v13 = vmul.f32 0.03125, %v988_v12 }
 0xdd2   :  { %v990_v14 = vadd.f32 1e-05, %v989_v13 }
 0xdd3   :  { %v721_v15 = vpop.xlane.xlu0 %720 }
 0xdd4   :  { %2913 = vrsqrt.f32 %v990_v14  ;;  %v722_v16 = vmul.f32 0.03125, %v721_v15  ;;  %v2875_v14 = vld [vmem:[#allocation6 + $0x88] sm:$0xff]  }
 0xdd6   :  { %v723_v17 = vadd.f32 1e-05, %v722_v16  ;;  %v2876_v16 = vld [vmem:[#allocation6 + $0x90] sm:$0xff]  }
 0xdd8   :  { %2915 = vrsqrt.f32 %v723_v17 }
 0xdde   :  { %v2914_v18 = vpop.eup %2913 }
 0xddf   :  { %v992_v20 = vmul.f32 %v2914_v18, %v984_v58 }
 0xde1   :  { %v997_v22 = vmul.f32 %v2399_v19, %v992_v20 }
 0xde2   :  { %v2916_v23 = vpop.eup %2915 }
 0xde3   :  { %v725_v25 = vmul.f32 %v2916_v23, %v717_v63  ;;  %v3332_v26 = vadd.f32 %v2400_v21, %v997_v22  ;;  %v2422_v22 = vld [vmem:[#allocation7 + $0x11] ss:$0 sm:$0xff] }
 0xde5   :  { %v730_v29 = vmul.f32 %v2387_v24, %v725_v25  ;;  %v1007_v30 = vpack.c.bf16 %v3332_v26, %v3332_v26 }
 0xde7   :  { %2675 = vmatmul.mubr.msk.bf16.vlgmr.msra.gmra.mrb[16].mxu1 %vm285_vm11, %v1007_v30  ;;  %v3340_v33 = vadd.f32 %v2388_v31, %v730_v29 }
 0xde8   :  { %2699 = vmatpush3.bf16.msra.mxu1 %v2865_v28  ;;  %2702 = vmatprep.mubr.msk.bf16.mxu1 %vm3081_vm0, %v3080_v2 }
 0xde9   :  { %2700 = vmatprep.subr.bf16.mxu1 %v3080_v2  ;;  %v1209_v34 = vpack.c.bf16 %v3340_v33, %v3340_v33 }
 0xdec   :  { %2701 = vmatpush3.bf16.msra.mxu1 %v2866_v32 }
 0xded   :  { %2706 = vmatprep.subr.bf16.mxu1 %v3080_v2 }
 0xdef   :  { %2703 = vmatmul.mubr.msk.bf16.vlgmr.msra.gmra.mrb[20].mxu1 %vm285_vm11, %v1209_v34 }
 0xdf0   :  { %2708 = vmatprep.mubr.msk.bf16.mxu1 %vm3081_vm0, %v3080_v2 }
 0xeba   :  { %v1062_v38 = vpop.f32.mrb[16].mxu1 }
 0xebb   :  { %v1063_v39 = vadd.f32 %v2401_v37, %v1062_v38  ;;  %v2676_v40 = vpop.f32.mrb[17].mxu1 }
 0xebc   :  { %v1065_v41 = vpop.f32.mrb[18].mxu1 }
 0xebd   :  { %v1068_v27 = vmax.f32 %v1063_v39, 0.0  ;;  %v2677_v42 = vpop.f32.mrb[19].mxu1 }
 0xebe   :  { %v2881_v42 = vld [vmem:[#allocation6 + $0xa8] sm:$0xff]  }
 0xebf   :  { %v1085_v43 = vpack.c.bf16 %v1068_v27, %v1068_v27  ;;  %v2877_v27 = vld [vmem:[#allocation6 + $0x98] sm:$0xff]  }
 0xec1   :  { %2695 = vmatmul.mubr.bf16.vlgmr.msra.gmra.mrb[32].mxu0 %v1085_v43  ;;  %v2882_v43 = vld [vmem:[#allocation6 + $0xb0] sm:$0xff]  }
 0xec2   :  { %v1264_v45 = vpop.f32.mrb[20].mxu1  ;;  %2730 = vmatprep.mubr.msk.bf16.mxu0 %vm3081_vm0, %v3080_v2  ;;  %2727 = vmatpush3.bf16.msra.mxu0 %v2877_v27 }
 0xec3   :  { %v1265_v46 = vadd.f32 %v2416_v44, %v1264_v45  ;;  %v2704_v47 = vpop.f32.mrb[21].mxu1  ;;  %2728 = vmatprep.subr.bf16.mxu0 %v3080_v2  ;;  %v2883_v44 = vld [vmem:[#allocation6 + $0xb8] sm:$0xff]   ;;  %v2884_v45 = vld [vmem:[#allocation6 + $0xc0] sm:$0xff]  }
 0xec4   :  { %v1267_v48 = vpop.f32.mrb[22].mxu1  ;;  %v2886_v47 = vld [vmem:[#allocation6 + $0xd0] sm:$0xff]  }
 0xec5   :  { %v1270_v49 = vpack.c.bf16 %v1265_v46, %v1265_v46  ;;  %v2705_v50 = vpop.f32.mrb[23].mxu1  ;;  %v2885_v46 = vld [vmem:[#allocation6 + $0xc8] sm:$0xff]  }
 0xec7   :  { %1272 = vrot.lane.b32.xlu0 %v1270_v49, %s3082_s1 }
 0xf39   :  { %v1273_v51 = vpop.permute.xlu0 %1272 }
 0xf3a   :  { %v1278_v52 = vsel %vm285_vm11, %v1273_v51, 0 }
 0xf3b   :  { %2707 = vmatpush3.bf16.xpose.msra.mxu1 %v1278_v52 }
 0xf3c   :  { %2712 = vmatprep.subr.bf16.mxu1 %v3080_v2 }
 0xf42   :  { %2709 = vmatmul.mubr.msk.bf16.vlgmr.msra.gmra.mrb[24].mxu1 %vm285_vm11, %v1270_v49 }
 0xf43   :  { %2714 = vmatprep.mubr.msk.bf16.mxu1 %vm3081_vm0, %v3080_v2 }
 0xf94   :  { %v1173_v53 = vpop.f32.mrb[32].mxu0 }
 0xf95   :  { %v2696_v54 = vpop.f32.mrb[33].mxu0  ;;  %v1174_v6 = vadd.f32 %v2405_v60, %v1173_v53 }
 0xf96   :  { %v1176_v55 = vpop.f32.mrb[34].mxu0 }
 0xf97   :  { %v2697_v56 = vpop.f32.mrb[35].mxu0  ;;  %v1179_v7 = vadd.f32 %v1174_v6, %v3332_v26  ;;  %v2426_v55 = vld [vmem:[#allocation7 + $0x12] ss:$0 sm:$0xff] }
 0xf99   :  { %v1182_v8 = vsel %vm285_vm11, %v1179_v7, 0.0 }
0x1015   :  { %v1314_v57 = vpop.f32.mrb[24].mxu1 }
0x1016   :  { %v1320_v59 = vmul.f32 0.17677669, %v1314_v57  ;;  %v2710_v61 = vpop.f32.mrb[25].mxu1  ;;  %v2427_v57 = vld [vmem:[#allocation7 + $0x13] ss:$0 sm:$0xff] }
0x1017   :  { %v1317_v62 = vpop.f32.mrb[26].mxu1 }
0x1018   :  { %v2711_v63 = vpop.f32.mrb[27].mxu1  ;;  %v1321_v58 = vsel %vm380_vm13, %v1320_v59, -inf  ;;  %v2414_v62 = vld [vmem:[#allocation10 + $0xe] ss:$0 sm:$0xff] }
0x1019   :  { %1322 = vmax.xlane.f32.xlu1 %v1321_v58 }
0x10a6   :  { %v1323_v0 = vpop.xlane.xlu1 %1322 }
0x10a7   :  { %v1324_v1 = vsub.f32 %v1320_v59, %v1323_v0  ;;  %v2879_v0 = vld [vmem:[#allocation9 + $0x78] sm:$0xff]  }
0x10a9   :  { %v1325_v3 = vmul.f32 1.442695, %v1324_v1 }
0x10ab   :  { %2917 = vpow2.f32 %v1325_v3 }
0x10b5   :  { %v2918_v4 = vpop.eup %2917 }
0x10b6   :  { %v1327_v5 = vsel %vm380_vm13, %v2918_v4, 0.0 }
0x10b7   :  { %1328 = vadd.xlane.f32.xlu1 %v1327_v5  ;;  %v2880_v5 = vld [vmem:[#allocation9 + $0x80] sm:$0xff]  }
0x10c8   :  { %1333 = vrot.lane.b32.xlu1 %v1270_v49, %s3076_s20 }
0x10ec   :  { %1183 = vadd.xlane.f32.xlu1 %v1182_v8  ;;  %v2888_v8 = vld [vmem:[#allocation6 + $0xe0] sm:$0xff]  }
0x1144   :  { %v1329_v9 = vpop.xlane.xlu1 %1328 }
0x1145   :  { %2919 = vrcp.f32 %v1329_v9  ;;  %v2428_v9 = vld [vmem:[#allocation7 + $0x14] ss:$0 sm:$0xff] }
0x1148   :  { %v1334_v10 = vpop.permute.xlu1 %1333 }
0x1149   :  { %v1339_v11 = vsel %vm398_vm14, %v1334_v10, 0 }
0x114a   :  { %2713 = vmatpush3.bf16.msra.mxu1 %v1339_v11 }
0x114b   :  { %2718 = vmatprep.subr.bf16.mxu1 %v3080_v2 }
0x114f   :  { %v2920_v12 = vpop.eup %2919 }
0x1150   :  { %v1331_v13 = vmul.f32 %v2920_v12, %v2918_v4  ;;  %v2415_v4 = vld [vmem:[#allocation10 + $0xf] ss:$0 sm:$0xff] }
0x1152   :  { %v1332_v15 = vpack.c.bf16 %v1331_v13, %v1331_v13 }
0x1154   :  { %2715 = vmatmul.mubr.msk.bf16.vlgmr.msra.gmra.mrb[28].mxu1 %vm380_vm13, %v1332_v15 }
0x1155   :  { %2719 = vmatpush3.bf16.msra.mxu1 %v2875_v14  ;;  %2722 = vmatprep.mubr.msk.bf16.mxu1 %vm3081_vm0, %v3080_v2 }
0x1156   :  { %2720 = vmatprep.subr.bf16.mxu1 %v3080_v2 }
0x1159   :  { %2721 = vmatpush3.bf16.msra.mxu1 %v2876_v16 }
0x115a   :  { %2734 = vmatprep.subr.bf16.mxu1 %v3080_v2 }
0x1179   :  { %v1184_v31 = vpop.xlane.xlu1 %1183 }
0x117a   :  { %v1185_v32 = vmul.f32 0.03125, %v1184_v31 }
0x117c   :  { %v1186_v36 = vsub.f32 %v1179_v7, %v1185_v32  ;;  %v2887_v7 = vld [vmem:[#allocation6 + $0xd8] sm:$0xff]  }
0x117e   :  { %v1187_v40 = vmul.f32 %v1186_v36, %v1186_v36 }
0x1180   :  { %v1188_v41 = vsel %vm285_vm11, %v1187_v40, 0.0 }
0x1227   :  { %v1375_v17 = vpop.f32.mrb[28].mxu1 }
0x1228   :  { %v1385_v18 = vpack.c.bf16 %v1375_v17, %v1375_v17  ;;  %v2716_v19 = vpop.f32.mrb[29].mxu1  ;;  %v2443_v17 = vld [vmem:[#allocation10 + $0x10] ss:$0 sm:$0xff] }
0x1229   :  { %v1378_v20 = vpop.f32.mrb[30].mxu1 }
0x122a   :  { %v2717_v21 = vpop.f32.mrb[31].mxu1  ;;  %2723 = vmatmul.mubr.msk.bf16.vlgmr.msra.gmra.mrb[32].mxu1 %vm285_vm11, %v1385_v18 }
0x122b   :  { %2750 = vmatprep.mubr.msk.bf16.mxu1 %vm3081_vm0, %v3080_v2  ;;  %2735 = vmatpush3.bf16.msra.mxu1 %v2881_v42 }
0x122c   :  { %2736 = vmatprep.subr.bf16.mxu1 %v3080_v2 }
0x122f   :  { %2737 = vmatpush3.bf16.msra.mxu1 %v2882_v43 }
0x1230   :  { %2738 = vmatprep.subr.bf16.mxu1 %v3080_v2 }
0x1233   :  { %2739 = vmatpush3.bf16.msra.mxu1 %v2883_v44 }
0x1234   :  { %2740 = vmatprep.subr.bf16.mxu1 %v3080_v2 }
0x1237   :  { %2741 = vmatpush3.bf16.msra.mxu1 %v2884_v45 }
0x1238   :  { %2742 = vmatprep.subr.bf16.mxu1 %v3080_v2 }
0x123b   :  { %2743 = vmatpush3.bf16.msra.mxu1 %v2885_v46  ;;  %v2889_v46 = vld [vmem:[#allocation9 + $0x88] sm:$0xff]  }
0x123c   :  { %2744 = vmatprep.subr.bf16.mxu1 %v3080_v2 }
0x123f   :  { %2745 = vmatpush3.bf16.msra.mxu1 %v2886_v47 }
0x1240   :  { %2746 = vmatprep.subr.bf16.mxu1 %v3080_v2 }
0x1243   :  { %2747 = vmatpush3.bf16.msra.mxu1 %v2887_v7 }
0x1244   :  { %2748 = vmatprep.subr.bf16.mxu1 %v3080_v2 }
0x1247   :  { %2749 = vmatpush3.bf16.msra.mxu1 %v2888_v8 }
0x1248   :  { %2782 = vmatprep.subr.bf16.mxu1 %v3080_v2 }
0x12fd   :  { %v1440_v23 = vpop.f32.mrb[32].mxu1 }
0x12fe   :  { %v1441_v24 = vadd.f32 %v2422_v22, %v1440_v23  ;;  %v2724_v25 = vpop.f32.mrb[33].mxu1 }
0x12ff   :  { %v1443_v26 = vpop.f32.mrb[34].mxu1 }
0x1300   :  { %v2725_v28 = vpop.f32.mrb[35].mxu1  ;;  %v1446_v29 = vadd.f32 %v1441_v24, %v3340_v33  ;;  %v2878_v33 = vld [vmem:[#allocation6 + $0xa0] sm:$0xff]  }
0x1301   :  { %2729 = vmatpush3.bf16.msra.mxu0 %v2878_v33 }
0x1302   :  { %v1449_v30 = vsel %vm285_vm11, %v1446_v29, 0.0  ;;  %2754 = vmatprep.subr.bf16.mxu0 %v3080_v2 }
0x1303   :  { %1450 = vadd.xlane.f32.xlu0 %v1449_v30 }
0x1390   :  { %v1451_v34 = vpop.xlane.xlu0 %1450 }
0x1391   :  { %v1452_v35 = vmul.f32 0.03125, %v1451_v34 }
0x1393   :  { %v1453_v37 = vsub.f32 %v1446_v29, %v1452_v35 }
0x1395   :  { %v1454_v38 = vmul.f32 %v1453_v37, %v1453_v37 }
0x1397   :  { %v1455_v39 = vsel %vm285_vm11, %v1454_v38, 0.0 }
0x1398   :  { %1456 = vadd.xlane.f32.xlu0 %v1455_v39 }
0x139c   :  { %1189 = vadd.xlane.f32.xlu0 %v1188_v41 }
0x1425   :  { %v1457_v48 = vpop.xlane.xlu0 %1456 }
0x1426   :  { %v1458_v49 = vmul.f32 0.03125, %v1457_v48  ;;  %v2890_v48 = vld [vmem:[#allocation9 + $0x90] sm:$0xff]  }
0x1428   :  { %v1459_v50 = vadd.f32 1e-05, %v1458_v49 }
0x1429   :  { %v1190_v51 = vpop.xlane.xlu0 %1189 }
0x142a   :  { %2921 = vrsqrt.f32 %v1459_v50  ;;  %v1191_v52 = vmul.f32 0.03125, %v1190_v51 }
0x142c   :  { %v1192_v53 = vadd.f32 1e-05, %v1191_v52 }
0x142e   :  { %2923 = vrsqrt.f32 %v1192_v53 }
0x1434   :  { %v2922_v54 = vpop.eup %2921 }
0x1435   :  { %v1461_v56 = vmul.f32 %v2922_v54, %v1453_v37  ;;  %v2432_v54 = vld [vmem:[#allocation7 + $0x15] ss:$0 sm:$0xff] }
0x1437   :  { %v1466_v59 = vmul.f32 %v2426_v55, %v1461_v56  ;;  %v2449_v55 = vld [vmem:[#allocation10 + $0x11] ss:$0 sm:$0xff] }
0x1438   :  { %v2924_v61 = vpop.eup %2923 }
0x1439   :  { %v1194_v63 = vmul.f32 %v2924_v61, %v1186_v36  ;;  %v3385_v58 = vadd.f32 %v2427_v57, %v1466_v59 }
0x143b   :  { %v1199_v1 = vmul.f32 %v2414_v62, %v1194_v63  ;;  %v1476_v3 = vpack.c.bf16 %v3385_v58, %v3385_v58 }
0x143d   :  { %2731 = vmatmul.mubr.msk.bf16.vlgmr.msra.gmra.mrb[36].mxu0 %vm285_vm11, %v1476_v3  ;;  %v3393_v60 = vadd.f32 %v2415_v4, %v1199_v1 }
0x143e   :  { %2755 = vmatpush3.bf16.msra.mxu0 %v2879_v0  ;;  %2758 = vmatprep.mubr.msk.bf16.mxu0 %vm3081_vm0, %v3080_v2 }
0x143f   :  { %2756 = vmatprep.subr.bf16.mxu0 %v3080_v2  ;;  %v1678_v6 = vpack.c.bf16 %v3393_v60, %v3393_v60 }
0x1442   :  { %2757 = vmatpush3.bf16.msra.mxu0 %v2880_v5 }
0x1443   :  { %2762 = vmatprep.subr.bf16.mxu0 %v3080_v2 }
0x1445   :  { %2759 = vmatmul.mubr.msk.bf16.vlgmr.msra.gmra.mrb[40].mxu0 %vm285_vm11, %v1678_v6 }
0x1446   :  { %2764 = vmatprep.mubr.msk.bf16.mxu0 %vm3081_vm0, %v3080_v2 }
0x1510   :  { %v1531_v10 = vpop.f32.mrb[36].mxu0 }
0x1511   :  { %v1532_v11 = vadd.f32 %v2428_v9, %v1531_v10  ;;  %v2732_v12 = vpop.f32.mrb[37].mxu0 }
0x1512   :  { %v1534_v13 = vpop.f32.mrb[38].mxu0 }
0x1513   :  { %v1537_v14 = vmax.f32 %v1532_v11, 0.0  ;;  %v2733_v15 = vpop.f32.mrb[39].mxu0 }
0x1514   :  { %v2895_v15 = vld [vmem:[#allocation9 + $0xa8] sm:$0xff]  }
0x1515   :  { %v1554_v16 = vpack.c.bf16 %v1537_v14, %v1537_v14  ;;  %v2891_v14 = vld [vmem:[#allocation9 + $0x98] sm:$0xff]  }
0x1517   :  { %2751 = vmatmul.mubr.bf16.vlgmr.msra.gmra.mrb[36].mxu1 %v1554_v16  ;;  %v2896_v16 = vld [vmem:[#allocation9 + $0xb0] sm:$0xff]  }
0x1518   :  { %v1733_v18 = vpop.f32.mrb[40].mxu0  ;;  %2786 = vmatprep.mubr.msk.bf16.mxu1 %vm3081_vm0, %v3080_v2  ;;  %2783 = vmatpush3.bf16.msra.mxu1 %v2891_v14 }
0x1519   :  { %v1734_v19 = vadd.f32 %v2443_v17, %v1733_v18  ;;  %v2760_v20 = vpop.f32.mrb[41].mxu0  ;;  %2784 = vmatprep.subr.bf16.mxu1 %v3080_v2  ;;  %v2897_v17 = vld [vmem:[#allocation9 + $0xb8] sm:$0xff]   ;;  %v2898_v18 = vld [vmem:[#allocation9 + $0xc0] sm:$0xff]  }
0x151a   :  { %v1736_v21 = vpop.f32.mrb[42].mxu0  ;;  %v2900_v20 = vld [vmem:[#allocation9 + $0xd0] sm:$0xff]  }
0x151b   :  { %v1739_v22 = vpack.c.bf16 %v1734_v19, %v1734_v19  ;;  %v2761_v23 = vpop.f32.mrb[43].mxu0  ;;  %v2899_v19 = vld [vmem:[#allocation9 + $0xc8] sm:$0xff]  }
0x151d   :  { %1741 = vrot.lane.b32.xlu0 %v1739_v22, %s3082_s1 }
0x158f   :  { %v1742_v24 = vpop.permute.xlu0 %1741 }
0x1590   :  { %v1747_v25 = vsel %vm285_vm11, %v1742_v24, 0 }
0x1591   :  { %2763 = vmatpush3.bf16.xpose.msra.mxu0 %v1747_v25 }
0x1592   :  { %2768 = vmatprep.subr.bf16.mxu0 %v3080_v2 }
0x1598   :  { %2765 = vmatmul.mubr.msk.bf16.vlgmr.msra.gmra.mrb[44].mxu0 %vm285_vm11, %v1739_v22 }
0x1599   :  { %2770 = vmatprep.mubr.msk.bf16.mxu0 %vm3081_vm0, %v3080_v2 }
0x15ea   :  { %v1642_v26 = vpop.f32.mrb[36].mxu1 }
0x15eb   :  { %v2752_v28 = vpop.f32.mrb[37].mxu1  ;;  %v1643_v57 = vadd.f32 %v2432_v54, %v1642_v26 }
0x15ec   :  { %v1645_v29 = vpop.f32.mrb[38].mxu1 }
0x15ed   :  { %v2753_v30 = vpop.f32.mrb[39].mxu1  ;;  %v1648_v3 = vadd.f32 %v1643_v57, %v3385_v58  ;;  %v2892_v58 = vld [vmem:[#allocation9 + $0xa0] sm:$0xff]  }
0x15ee   :  { %2785 = vmatpush3.bf16.msra.mxu1 %v2892_v58  ;;  %v2453_v29 = vld [vmem:[#allocation10 + $0x12] ss:$0 sm:$0xff] }
0x15ef   :  { %v1651_v4 = vsel %vm285_vm11, %v1648_v3, 0.0  ;;  %2810 = vmatprep.subr.bf16.mxu1 %v3080_v2 }
0x166b   :  { %v1783_v31 = vpop.f32.mrb[44].mxu0 }
0x166c   :  { %v1789_v32 = vmul.f32 0.17677669, %v1783_v31  ;;  %v2766_v34 = vpop.f32.mrb[45].mxu0  ;;  %v2454_v31 = vld [vmem:[#allocation10 + $0x13] ss:$0 sm:$0xff] }
0x166d   :  { %v1786_v35 = vpop.f32.mrb[46].mxu0 }
0x166e   :  { %v2767_v36 = vpop.f32.mrb[47].mxu0  ;;  %v1790_v37 = vsel %vm380_vm13, %v1789_v32, -inf  ;;  %v2441_v35 = vld [vmem:[#allocation7 + $0x16] ss:$0 sm:$0xff] }
0x166f   :  { %1791 = vmax.xlane.f32.xlu1 %v1790_v37 }
0x16fc   :  { %v1792_v38 = vpop.xlane.xlu1 %1791 }
0x16fd   :  { %v1793_v39 = vsub.f32 %v1789_v32, %v1792_v38  ;;  %v2893_v38 = vld [vmem:[#allocation6 + $0xe8] sm:$0xff]  }
0x16ff   :  { %v1794_v40 = vmul.f32 1.442695, %v1793_v39  ;;  %v2442_v39 = vld [vmem:[#allocation7 + $0x17] ss:$0 sm:$0xff] }
0x1701   :  { %2925 = vpow2.f32 %v1794_v40 }
0x170b   :  { %v2926_v41 = vpop.eup %2925 }
0x170c   :  { %v1796_v27 = vsel %vm380_vm13, %v2926_v41, 0.0 }
0x170d   :  { %1797 = vadd.xlane.f32.xlu1 %v1796_v27 }
0x171e   :  { %1802 = vrot.lane.b32.xlu1 %v1739_v22, %s3076_s20  ;;  %s3083_s20 = smov [#allocation12]  }
0x171f   :  { %s2329_s11 = sshll.u32 %s3083_s20, 4  ;;  %s2330_s11 = int_to_ptr.vmem [resolvable:$true] %s2329_s11 }
0x1720   :  { %s3039_s12 = scalar_lea.vmem %s2330_s11, 16  ;;  %s3043_s13 = scalar_lea.vmem %s2330_s11, 32 }
0x1721   :  { %p3040_p9 = scmp.ne.s32.totalorder %s2330_s11, %s3039_s12  ;;  %p3044_p10 = scmp.lt.s32.totalorder %s2330_s11, %s2330_s11 }
0x1722   :  { %p3045_p11 = scmp.lt.s32.totalorder %s3043_s13, %s3039_s12 }
0x1724   :  { %p3046_p12 = por %p3045_p11, %p3044_p10 }
0x1726   :  { %p3047_p13 = pnand %p3046_p12, %p3040_p9 }
0x179a   :  { %v1798_v33 = vpop.xlane.xlu1 %1797 }
0x179b   :  { %2927 = vrcp.f32 %v1798_v33  ;;  %v2894_v33 = vld [vmem:[#allocation6 + $0xf0] sm:$0xff]  }
0x179e   :  { %v1803_v42 = vpop.permute.xlu1 %1802 }
0x179f   :  { %v1808_v43 = vsel %vm398_vm14, %v1803_v42, 0 }
0x17a0   :  { %2769 = vmatpush3.bf16.msra.mxu0 %v1808_v43 }
0x17a1   :  { %2774 = vmatprep.subr.bf16.mxu0 %v3080_v2 }
0x17a5   :  { %v2928_v44 = vpop.eup %2927 }
0x17a6   :  { %v1800_v45 = vmul.f32 %v2928_v44, %v2926_v41 }
0x17a8   :  { %v1801_v47 = vpack.c.bf16 %v1800_v45, %v1800_v45  ;;  %v2901_v45 = vld [vmem:[#allocation9 + $0xd8] sm:$0xff]  }
0x17aa   :  { %2771 = vmatmul.mubr.msk.bf16.vlgmr.msra.gmra.mrb[48].mxu0 %vm380_vm13, %v1801_v47  ;;  %v2455_v47 = vld [vmem:[#allocation10 + $0x14] ss:$0 sm:$0xff] }
0x17ab   :  { %2775 = vmatpush3.bf16.msra.mxu0 %v2889_v46  ;;  %2778 = vmatprep.mubr.msk.bf16.mxu0 %vm3081_vm0, %v3080_v2  ;;  %v2902_v46 = vld [vmem:[#allocation9 + $0xe0] sm:$0xff]  }
0x17ac   :  { %2776 = vmatprep.subr.bf16.mxu0 %v3080_v2 }
0x17af   :  { %2777 = vmatpush3.bf16.msra.mxu0 %v2890_v48 }
0x17b0   :  { %2790 = vmatprep.subr.bf16.mxu0 %v3080_v2 }
0x187d   :  { %v1844_v49 = vpop.f32.mrb[48].mxu0 }
0x187e   :  { %v1854_v50 = vpack.c.bf16 %v1844_v49, %v1844_v49  ;;  %v2772_v51 = vpop.f32.mrb[49].mxu0 }
0x187f   :  { %v1847_v52 = vpop.f32.mrb[50].mxu0 }
0x1880   :  { %v2773_v53 = vpop.f32.mrb[51].mxu0  ;;  %2779 = vmatmul.mubr.msk.bf16.vlgmr.msra.gmra.mrb[52].mxu0 %vm285_vm11, %v1854_v50 }
0x1881   :  { %2806 = vmatprep.mubr.msk.bf16.mxu0 %vm3081_vm0, %v3080_v2  ;;  %2791 = vmatpush3.bf16.msra.mxu0 %v2895_v15 }
0x1882   :  { %2792 = vmatprep.subr.bf16.mxu0 %v3080_v2 }
0x1885   :  { %2793 = vmatpush3.bf16.msra.mxu0 %v2896_v16  ;;  %v2468_v16 = vld [vmem:[#allocation10 + $0x16] ss:$0 sm:$0xff] }
0x1886   :  { %2794 = vmatprep.subr.bf16.mxu0 %v3080_v2 }
0x1889   :  { %2795 = vmatpush3.bf16.msra.mxu0 %v2897_v17 }
0x188a   :  { %2796 = vmatprep.subr.bf16.mxu0 %v3080_v2 }
0x188d   :  { %2797 = vmatpush3.bf16.msra.mxu0 %v2898_v18  ;;  %v2469_v18 = vld [vmem:[#allocation10 + $0x17] ss:$0 sm:$0xff] }
0x188e   :  { %2798 = vmatprep.subr.bf16.mxu0 %v3080_v2 }
0x1891   :  { %2799 = vmatpush3.bf16.msra.mxu0 %v2899_v19 }
0x1892   :  { %2800 = vmatprep.subr.bf16.mxu0 %v3080_v2 }
0x1895   :  { %2801 = vmatpush3.bf16.msra.mxu0 %v2900_v20 }
0x1896   :  { %2802 = vmatprep.subr.bf16.mxu0 %v3080_v2 }
0x1899   :  { %2803 = vmatpush3.bf16.msra.mxu0 %v2901_v45 }
0x189a   :  { %2804 = vmatprep.subr.bf16.mxu0 %v3080_v2 }
0x189d   :  { %2805 = vmatpush3.bf16.msra.mxu0 %v2902_v46 }
0x1953   :  { %v1909_v56 = vpop.f32.mrb[52].mxu0 }
0x1954   :  { %v1910_v59 = vadd.f32 %v2449_v55, %v1909_v56  ;;  %v2780_v61 = vpop.f32.mrb[53].mxu0 }
0x1955   :  { %v1912_v62 = vpop.f32.mrb[54].mxu0  ;;  %v2459_v61 = vld [vmem:[#allocation10 + $0x15] ss:$0 sm:$0xff] }
0x1956   :  { %v2781_v63 = vpop.f32.mrb[55].mxu0  ;;  %v1915_v0 = vadd.f32 %v1910_v59, %v3393_v60 }
0x1958   :  { %v1918_v1 = vsel %vm285_vm11, %v1915_v0, 0.0 }
0x1959   :  { %1919 = vadd.xlane.f32.xlu0 %v1918_v1 }
0x195d   :  { %1652 = vadd.xlane.f32.xlu0 %v1651_v4 }
0x19e6   :  { %v1920_v5 = vpop.xlane.xlu0 %1919 }
0x19e7   :  { %v1921_v6 = vmul.f32 0.03125, %v1920_v5 }
0x19e9   :  { %v1922_v7 = vsub.f32 %v1915_v0, %v1921_v6 }
0x19ea   :  { %v1653_v8 = vpop.xlane.xlu0 %1652 }
0x19eb   :  { %v1654_v9 = vmul.f32 0.03125, %v1653_v8  ;;  %v1923_v10 = vmul.f32 %v1922_v7, %v1922_v7 }
0x19ed   :  { %v1655_v11 = vsub.f32 %v1648_v3, %v1654_v9  ;;  %v1924_v12 = vsel %vm285_vm11, %v1923_v10, 0.0  ;;  %v2148_v9 = vld [vmem:[#allocation7 + $0x18] sm:$0x1] }
0x19ee   :  { %1925 = vadd.xlane.f32.xlu1 %v1924_v12 }
0x19ef   :  { %v1656_v13 = vmul.f32 %v1655_v11, %v1655_v11 }
0x19f1   :  { %v1657_v60 = vsel %vm285_vm11, %v1656_v13, 0.0 }
0x19f2   :  { %1658 = vadd.xlane.f32.xlu0 %v1657_v60 }
0x1a7b   :  { %v1926_v21 = vpop.xlane.xlu1 %1925 }
0x1a7c   :  { %v1927_v22 = vmul.f32 0.03125, %v1926_v21 }
0x1a7e   :  { %v1928_v23 = vadd.f32 1e-05, %v1927_v22 }
0x1a7f   :  { %v1659_v24 = vpop.xlane.xlu0 %1658 }
0x1a80   :  { %2929 = vrsqrt.f32 %v1928_v23  ;;  %v1660_v25 = vmul.f32 0.03125, %v1659_v24  ;;  %v2256_v23 = vld [vmem:[#allocation9 + $0xe8] sm:$0xf] }
0x1a82   :  { %v1661_v26 = vadd.f32 1e-05, %v1660_v25  ;;  %v2268_v25 = vsel %vm398_vm14, %v2256_v23, 0 }
0x1a84   :  { %2931 = vrsqrt.f32 %v1661_v26 }
0x1a8a   :  { %v2930_v28 = vpop.eup %2929 }
0x1a8b   :  { %v1930_v30 = vmul.f32 %v2930_v28, %v1922_v7 }
0x1a8d   :  { %v1935_v32 = vmul.f32 %v2453_v29, %v1930_v30 }
0x1a8e   :  { %v2932_v34 = vpop.eup %2931 }
0x1a8f   :  { %v1663_v36 = vmul.f32 %v2932_v34, %v1655_v11  ;;  %v1940_v37 = vadd.f32 %v2454_v31, %v1935_v32  ;;  %v2262_v32 = vld [vmem:[#allocation10 + $0x18] sm:$0x1] }
0x1a91   :  { %v1668_v40 = vmul.f32 %v2441_v35, %v1663_v36  ;;  %v1945_v41 = vpack.c.bf16 %v1940_v37, %v1940_v37 }
0x1a93   :  { %2787 = vmatmul.mubr.msk.bf16.vlgmr.msra.gmra.mrb[40].mxu1 %vm285_vm11, %v1945_v41  ;;  %v1673_v27 = vadd.f32 %v2442_v39, %v1668_v40 }
0x1a94   :  { %2811 = vmatpush3.bf16.msra.mxu1 %v2893_v38  ;;  %2814 = vmatprep.mubr.msk.bf16.mxu1 %vm3081_vm0, %v3080_v2 }
0x1a95   :  { %2812 = vmatprep.subr.bf16.mxu1 %v3080_v2  ;;  %v2147_v42 = vpack.c.bf16 %v1673_v27, %v1673_v27 }
0x1a97   :  { %v2150_v43 = vshrl.u32 %v2147_v42, 16 }
0x1a98   :  { %2813 = vmatpush3.bf16.msra.mxu1 %v2894_v33 }
0x1a99   :  { %v2152_v44 = vrot.slane %v2150_v43, 3  ;;  %2818 = vmatprep.subr.bf16.mxu1 %v3080_v2 }
0x1a9b   :  { %2815 = vmatmul.mubr.msk.bf16.vlgmr.msra.gmra.mrb[44].mxu1 %vm285_vm11, %v2152_v44 }
0x1a9c   :  { %2820 = vmatprep.mubr.msk.bf16.mxu1 %vm3081_vm0, %v3080_v2 }
0x1b66   :  { %v2000_v48 = vpop.f32.mrb[40].mxu1 }
0x1b67   :  { %v2001_v49 = vadd.f32 %v2455_v47, %v2000_v48  ;;  %v2788_v50 = vpop.f32.mrb[41].mxu1 }
0x1b68   :  { %v2003_v51 = vpop.f32.mrb[42].mxu1 }
0x1b69   :  { %v2006_v52 = vmax.f32 %v2001_v49, 0.0  ;;  %v2789_v53 = vpop.f32.mrb[43].mxu1 }
0x1b6b   :  { %v2023_v54 = vpack.c.bf16 %v2006_v52, %v2006_v52 }
0x1b6d   :  { %2807 = vmatmul.mubr.bf16.vlgmr.msra.gmra.mrb[56].mxu0 %v2023_v54 }
0x1b6e   :  { %v2202_v55 = vpop.f32.mrb[44].mxu1 }
0x1b6f   :  { %v2816_v56 = vpop.f32.mrb[45].mxu1  ;;  %v2203_v11 = vadd.f32 %v2202_v55, %v2148_v9 }
0x1b70   :  { %v2205_v57 = vpop.f32.mrb[46].mxu1 }
0x1b71   :  { %v2817_v59 = vpop.f32.mrb[47].mxu1  ;;  %v2259_v13 = vsel %vm2258_vm15, %v2203_v11, 0.0  ;;  %v2208_v24 = vpack.c.bf16 %v2203_v11, %v2203_v11 }
0x1c40   :  { %v2111_v62 = vpop.f32.mrb[56].mxu0 }
0x1c41   :  { %v2112_v63 = vadd.f32 %v2459_v61, %v2111_v62  ;;  %v2808_v0 = vpop.f32.mrb[57].mxu0 }
0x1c42   :  { %v2114_v1 = vpop.f32.mrb[58].mxu0 }
0x1c43   :  { %v2809_v3 = vpop.f32.mrb[59].mxu0  ;;  %v2117_v4 = vadd.f32 %v2112_v63, %v1940_v37 }
0x1c45   :  { %v2120_v5 = vsel %vm285_vm11, %v2117_v4, 0.0 }
0x1c46   :  { %2121 = vadd.xlane.f32.xlu0 %v2120_v5 }
0x1cd3   :  { %v2122_v6 = vpop.xlane.xlu0 %2121 }
0x1cd4   :  { %v2123_v7 = vmul.f32 0.03125, %v2122_v6 }
0x1cd6   :  { %v2124_v8 = vsub.f32 %v2117_v4, %v2123_v7 }
0x1cd8   :  { %v2125_v10 = vmul.f32 %v2124_v8, %v2124_v8 }
0x1cda   :  { %v2126_v12 = vsel %vm285_vm11, %v2125_v10, 0.0 }
0x1cdb   :  { %2127 = vadd.xlane.f32.xlu0 %v2126_v12 }
0x1cdf   :  { %2260 = vadd.xlane.f32.xlu0 %v2259_v13 }
0x1d68   :  { %v2128_v60 = vpop.xlane.xlu0 %2127 }
0x1d69   :  { %v2129_v14 = vmul.f32 0.03125, %v2128_v60 }
0x1d6b   :  { %v2130_v58 = vadd.f32 1e-05, %v2129_v14 }
0x1d6c   :  { %v2261_v34 = vpop.xlane.xlu0 %2260 }
0x1d6d   :  { %2933 = vrsqrt.f32 %v2130_v58  ;;  %v2263_v35 = vmul.f32 %v2262_v32, %v2261_v34 }
0x1d77   :  { %v2934_v15 = vpop.eup %2933 }
0x1d78   :  { %v2132_v17 = vmul.f32 %v2934_v15, %v2124_v8 }
0x1d7a   :  { %v2137_v19 = vmul.f32 %v2468_v16, %v2132_v17 }
0x1d7c   :  { %v2142_v20 = vadd.f32 %v2469_v18, %v2137_v19 }
0x1d7e   :  { %v2209_v21 = vpack.c.bf16 %v2142_v20, %v2142_v20 }
0x1d80   :  { %v2214_v22 = vsel %vm285_vm11, %v2209_v21, 0 }
0x1d81   :  { %2819 = vmatpush3.bf16.xpose.msra.mxu1 %v2214_v22 }
0x1d82   :  { %2824 = vmatprep.subr.bf16.mxu1 %v3080_v2 }
0x1d88   :  { %2821 = vmatmul.mubr.msk.bf16.vlgmr.msra.gmra.mrb[48].mxu1 %vm285_vm11, %v2208_v24 }
0x1d89   :  { %2825 = vmatpush3.bf16.msra.mxu1 %v2268_v25  ;;  %2826 = vmatprep.mubr.msk.bf16.mxu1 %vm3081_vm0, %v3080_v2 }
0x1e5b   :  { %v2250_v26 = vpop.f32.mrb[48].mxu1 }
0x1e5c   :  { %v2257_v28 = vpack.c.bf16 %v2250_v26, %v2250_v26  ;;  %v2822_v29 = vpop.f32.mrb[49].mxu1 }
0x1e5d   :  { %v2253_v30 = vpop.f32.mrb[50].mxu1 }
0x1e5e   :  { %v2823_v31 = vpop.f32.mrb[51].mxu1  ;;  %2827 = vmatmul.mubr.msk.bf16.vlgmr.msra.gmra.mrb[52].mxu1 %vm380_vm13, %v2257_v28 }
0x1f31   :  { %v2304_v36 = vpop.f32.mrb[52].mxu1 }
0x1f32   :  { %v2305_v37 = vadd.f32 %v2304_v36, %v2263_v35  ;;  %v2828_v38 = vpop.f32.mrb[53].mxu1 }
0x1f33   :  { %v2307_v39 = vpop.f32.mrb[54].mxu1 }
0x1f34   :  { %v2829_v40 = vpop.f32.mrb[55].mxu1  ;;  %v2311_v41 = vsel %vm2310_vm1, %v2305_v37, -inf }
0x1f35   :  { %2312 = vmax.xlane.f32.xlu1 %v2311_v41 }
0x1fc2   :  { %v2313_v2 = vpop.xlane.xlu1 %2312 }
0x1fc3   :  { %v2314_v27 = vsub.f32 %v2305_v37, %v2313_v2 }
0x1fc5   :  { %v2315_v33 = vmul.f32 1.442695, %v2314_v27 }
0x1fc7   :  { %2935 = vpow2.f32 %v2315_v33 }
0x1fd1   :  { %v2936_v42 = vpop.eup %2935 }
0x1fd2   :  { %v2317_v43 = vsel %vm2310_vm1, %v2936_v42, 0.0 }
0x1fd3   :  { %2318 = vadd.xlane.f32.xlu0 %v2317_v43 }
0x2060   :  { %v2319_v44 = vpop.xlane.xlu0 %2318 }
0x2061   :  { %2937 = vrcp.f32 %v2319_v44 }
0x206b   :  { %v2938_v45 = vpop.eup %2937 }
0x206c   :  { %v2321_v46 = vmul.f32 %v2938_v45, %v2936_v42 }
0x206e   :  { %2322 = vst.msk [vmem:[#allocation12] sm:$0x1] %vm2310_vm1, %v2321_v46 }
0x206f   :  { %3050 = shalt.err (!%p3047_p13)
}
0x2070   :  { %s3051_s16 = scalar_lea.hbm %s3476_s5, 16 }
0x2071   :  { %p3052_p0 = scmp.ne.s32.totalorder %s3476_s5, %s3051_s16  ;;  %p3055_p1 = scmp.lt.u32.totalorder %s3051_s16, %s3476_s5 }
0x2073   :  { %p3057_p2 = pnand %p3055_p1, %p3052_p0 }
0x2075   :  { %3060 = shalt.err (!%p3057_p2)
}
0x2076   :  { %2332 = dma.vmem_to_hbm [thread:$0]  %s2330_s11, 16, %s3476_s5, [#allocation4]  }
0x2077   :  { %3069 = dma.done.wait [#allocation4], 16  }
0x2078   :  { %3070 = vsyncadd [#allocation4], 4294967280 }
0x2079   :  { %2336 = vsyncpa [#allocation3], 1 }
0x207a   :  { %2337 = vsyncpa [#allocation8], 1 }
0x207b   :  { %2338 = vsyncpa [#allocation11], 1 }
0x207c   :  { %2339 = vsyncpa [#allocation4], 1 }
0x207d   :  { %2340 = vsyncpa [#allocation5], 1 }

</bundles_post_ra>
